<compile_context>
chip_gen: v6e
topology: v6e:2x2x1
jax: 0.10.0
libtpu: 0.0.40
codegen_flags: <defaults>
</compile_context>

<pallas_src>
import functools

import jax
import jax.numpy as jnp
from jax import lax
from jax.experimental import pallas as pl
from jax.experimental.pallas import tpu as pltpu

IN_DIM = 64
HIDDEN = 32
LATENT = 8
BN_EPS = 1e-5
COMPUTE_DTYPE = jnp.bfloat16    # MXU operand dtype; accumulation is always f32
DEFAULT_TILE_B = 2048           # big tiles amortize ~0.35us/step; ~2 MiB working set


# ----------------------------- kernels ---------------------------------------
def encode_stats_kernel(x_ref, w1_ref, b1_ref, w2_ref, b2_ref, z_ref, stats_ref,
                        *, batch, tb):
    """Pass 1: encoder up to the latent z; stage z (bf16) and per-tile (sum, M2) stats."""
    x = x_ref[...].astype(COMPUTE_DTYPE)                                  # in-kernel cast
    h1 = jnp.dot(x, w1_ref[...], preferred_element_type=jnp.float32) + b1_ref[...]
    h1 = jnp.maximum(h1, 0.0)                                             # ReLU (f32)
    z = jnp.dot(h1.astype(w2_ref.dtype), w2_ref[...],
                preferred_element_type=jnp.float32) + b2_ref[...]         # [tb, 8] f32
    z_ref[...] = z.astype(z_ref.dtype)                                    # stage z for pass 2

    # Masked per-tile statistics (handles the padded tail tile of a cdiv grid).
    remaining = batch - pl.program_id(0) * tb                             # rows still valid
    count = jnp.minimum(remaining, tb).astype(jnp.float32)
    rows = lax.broadcasted_iota(jnp.int32, (tb, LATENT), 0)
    valid = rows < remaining
    zm = jnp.where(valid, z, 0.0)
    s = jnp.sum(zm, axis=0, keepdims=True)                                # [1, LATENT]
    mean_t = s / count
    centered = jnp.where(valid, z - mean_t, 0.0)
    m2 = jnp.sum(centered * centered, axis=0, keepdims=True)              # [1, LATENT]
    stats_ref[...] = jnp.concatenate([s, m2], axis=-1).reshape(1, 1, 2 * LATENT)


def decode_kernel(z_ref, scale_ref, shift_ref, w3_ref, b3_ref, w4_ref, b4_ref, o_ref):
    """Pass 2: folded-BN affine + decoder for one batch tile of the staged latent z."""
    z = z_ref[...].astype(jnp.float32)                                    # [tb, 8]
    z_bn = z * scale_ref[...] + shift_ref[...]                            # BN affine (folded)
    h2 = jnp.dot(z_bn.astype(w3_ref.dtype), w3_ref[...],
                 preferred_element_type=jnp.float32) + b3_ref[...]
    h2 = jnp.maximum(h2, 0.0)
    out = jnp.dot(h2.astype(w4_ref.dtype), w4_ref[...],
                  preferred_element_type=jnp.float32) + b4_ref[...]       # [tb, 64] f32
    o_ref[...] = out.astype(o_ref.dtype)


# ----------------------------- wrapper ----------------------------------------
def _pick_tile(batch, max_tile=DEFAULT_TILE_B):
    """Batch tile: multiple of 8, <= max_tile, and (when possible) >= 2 grid steps so the
    'parallel' batch axis spans both v7x TensorCores. Tail tiles are masked in-kernel."""
    tb = min(max_tile, batch)
    if batch > 8:
        tb = min(tb, (batch + 1) // 2)     # force nt >= 2
    tb = (tb // 8) * 8
    return max(tb, 8)


def autoencoder_forward(x, params, tile_b=DEFAULT_TILE_B):
    (w1, b1, w2, b2, gamma, beta, w3, b3, w4, b4) = params
    batch = x.shape[0]
    tb = _pick_tile(batch, tile_b)
    nt = (batch + tb - 1) // tb

    # bf16 MXU operands; biases / BN params stay f32. (Tiny traced casts, negligible.)
    w1_c = w1.astype(COMPUTE_DTYPE)
    w2_c = w2.astype(COMPUTE_DTYPE)
    w3_c = w3.astype(COMPUTE_DTYPE)
    w4_c = w4.astype(COMPUTE_DTYPE)

    parallel = pltpu.CompilerParams(dimension_semantics=("parallel",))

    # ---- pass 1: encoder -> staged latent z + per-tile BN statistics ----
    z, stats = pl.pallas_call(
        functools.partial(encode_stats_kernel, batch=batch, tb=tb),
        grid=(nt,),
        in_specs=[
            pl.BlockSpec((tb, IN_DIM), lambda i: (i, 0)),          # x tile (f32)
            pl.BlockSpec((IN_DIM, HIDDEN), lambda i: (0, 0)),      # w1 (VMEM-resident)
            pl.BlockSpec((1, HIDDEN), lambda i: (0, 0)),           # b1
            pl.BlockSpec((HIDDEN, LATENT), lambda i: (0, 0)),      # w2
            pl.BlockSpec((1, LATENT), lambda i: (0, 0)),           # b2
        ],
        out_specs=(
            pl.BlockSpec((tb, LATENT), lambda i: (i, 0)),          # z (bf16)
            pl.BlockSpec((1, 1, 2 * LATENT), lambda i: (i, 0, 0)),  # [sum | M2]
        ),
        out_shape=(
            jax.ShapeDtypeStruct((batch, LATENT), COMPUTE_DTYPE),
            jax.ShapeDtypeStruct((nt, 1, 2 * LATENT), jnp.float32),
        ),
        compiler_params=parallel,
    )(x, w1_c, b1, w2_c, b2)

    # ---- combine per-tile stats (Chan/Welford) -> folded BN affine, tiny XLA ops ----
    stats2d = stats[:, 0, :]                                   # (nt, 2*LATENT)
    sums = stats2d[:, :LATENT]                                 # (nt, LATENT)
    m2s = stats2d[:, LATENT:]                                  # (nt, LATENT)
    counts = jnp.asarray([float(min(tb, batch - i * tb)) for i in range(nt)],
                         jnp.float32)[:, None]                 # (nt, 1), static per-tile rows
    mean_t = sums / counts
    mean = jnp.sum(sums, axis=0, keepdims=True) / batch        # [1, LATENT]
    m2 = jnp.sum(m2s + counts * (mean_t - mean) ** 2, axis=0, keepdims=True)
    var = m2 / batch                                           # biased variance (train mode)
    inv_std = lax.rsqrt(var + BN_EPS)
    scale = gamma * inv_std                                    # [1, LATENT]
    shift = beta - mean * scale                                # [1, LATENT]

    # ---- pass 2: BN affine + decoder per batch tile (x never re-read) ----
    out = pl.pallas_call(
        decode_kernel,
        grid=(nt,),
        in_specs=[
            pl.BlockSpec((tb, LATENT), lambda i: (i, 0)),          # z tile (bf16)
            pl.BlockSpec((1, LATENT), lambda i: (0, 0)),           # scale
            pl.BlockSpec((1, LATENT), lambda i: (0, 0)),           # shift
            pl.BlockSpec((LATENT, HIDDEN), lambda i: (0, 0)),      # w3
            pl.BlockSpec((1, HIDDEN), lambda i: (0, 0)),           # b3
            pl.BlockSpec((HIDDEN, IN_DIM), lambda i: (0, 0)),      # w4 (unpadded, 64-wide)
            pl.BlockSpec((1, IN_DIM), lambda i: (0, 0)),           # b4
        ],
        out_specs=pl.BlockSpec((tb, IN_DIM), lambda i: (i, 0)),
        out_shape=jax.ShapeDtypeStruct((batch, IN_DIM), jnp.float32),
        compiler_params=parallel,
    )(z, scale, shift, w3_c, b3, w4_c, b4)

    return out


# ----------------------------- params / reference -----------------------------
def init_linear(key, fan_in, fan_out):
    """PyTorch-style Linear init (uniform +-1/sqrt(fan_in)); weight returned as [in, out]."""
    kw, kb = jax.random.split(key)
    bound = 1.0 / jnp.sqrt(float(fan_in))
    w = jax.random.uniform(kw, (fan_in, fan_out), jnp.float32, -bound, bound)
    b = jax.random.uniform(kb, (1, fan_out), jnp.float32, -bound, bound)
    return w, b


def make_params(key):
    k1, k2, k3, k4 = jax.random.split(key, 4)
    w1, b1 = init_linear(k1, IN_DIM, HIDDEN)    # encode Linear(64, 32)
    w2, b2 = init_linear(k2, HIDDEN, LATENT)    # encode Linear(32, 8)
    gamma = jnp.ones((1, LATENT), jnp.float32)  # BatchNorm1d weight
    beta = jnp.zeros((1, LATENT), jnp.float32)  # BatchNorm1d bias
    w3, b3 = init_linear(k3, LATENT, HIDDEN)    # decode Linear(8, 32)
    w4, b4 = init_linear(k4, HIDDEN, IN_DIM)    # decode Linear(32, 64)
    return (w1, b1, w2, b2, gamma, beta, w3, b3, w4, b4)


def reference_forward(x, params, compute_dtype):
    """Pure-JAX reference. compute_dtype=bf16 mirrors the kernel's MXU operands and the bf16
    HBM round trip of the staged latent z."""
    (w1, b1, w2, b2, gamma, beta, w3, b3, w4, b4) = params
    cd = compute_dtype
    h1 = jnp.maximum(
        jnp.dot(x.astype(cd), w1.astype(cd), preferred_element_type=jnp.float32) + b1, 0.0)
    z = jnp.dot(h1.astype(cd), w2.astype(cd), preferred_element_type=jnp.float32) + b2
    mean = jnp.mean(z, axis=0, keepdims=True)
    var = jnp.mean((z - mean) ** 2, axis=0, keepdims=True)     # biased (train mode)
    scale = gamma * lax.rsqrt(var + BN_EPS)
    shift = beta - mean * scale
    z_rt = z.astype(cd).astype(jnp.float32)                    # z round-trips HBM in cd
    z_bn = z_rt * scale + shift
    h2 = jnp.maximum(
        jnp.dot(z_bn.astype(cd), w3.astype(cd), preferred_element_type=jnp.float32) + b3, 0.0)
    return jnp.dot(h2.astype(cd), w4.astype(cd), preferred_element_type=jnp.float32) + b4


# ----------------------------- main --------------------------------------------
if __name__ == "__main__":
    key = jax.random.PRNGKey(0)
    kx, kp = jax.random.split(key)
    params = make_params(kp)

    # Case 1: batch 512 -> two tiles of 256 on the parallel batch grid (exact division).
    BATCH = 512
    x = jax.random.normal(kx, (BATCH, IN_DIM), jnp.float32)
    fwd = jax.jit(autoencoder_forward)
    out = jax.block_until_ready(fwd(x, params))
    assert out.shape == (BATCH, IN_DIM)

    ref_mixed = reference_forward(x, params, COMPUTE_DTYPE)
    err = float(jnp.max(jnp.abs(out - ref_mixed)))
    assert err < 2e-3, err
    ref_f32 = reference_forward(x, params, jnp.float32)
    assert float(jnp.max(jnp.abs(out - ref_f32))) < 0.25   # bf16 quantization noise only

    # Case 2: awkward batch (300, tile 128 -> tiles 128/128/44) exercises the masked tail.
    B2 = 300
    x2 = jax.random.normal(jax.random.PRNGKey(1), (B2, IN_DIM), jnp.float32)
    fwd_small = jax.jit(lambda a, p: autoencoder_forward(a, p, tile_b=128))
    out2 = jax.block_until_ready(fwd_small(x2, params))
    assert out2.shape == (B2, IN_DIM)
    ref2 = reference_forward(x2, params, COMPUTE_DTYPE)
    err2 = float(jnp.max(jnp.abs(out2 - ref2)))
    assert err2 < 2e-3, err2

    print("KERNEL_OK")
</pallas_src>

<mosaic_0001>
module attributes {stable_mosaic.version = 11 : i64} {
  func.func @decode_kernel(%arg0: i32, %arg1: memref<256x8xbf16, #tpu.memory_space<vmem>>, %arg2: memref<1x8xf32, #tpu.memory_space<vmem>>, %arg3: memref<1x8xf32, #tpu.memory_space<vmem>>, %arg4: memref<8x32xbf16, #tpu.memory_space<vmem>>, %arg5: memref<1x32xf32, #tpu.memory_space<vmem>>, %arg6: memref<32x64xbf16, #tpu.memory_space<vmem>>, %arg7: memref<1x64xf32, #tpu.memory_space<vmem>>, %arg8: memref<256x64xf32, #tpu.memory_space<vmem>>) attributes {dimension_semantics = [#tpu.dimension_semantics<parallel>], iteration_bounds = array<i64: 2>, scalar_prefetch = 0 : i64, scratch_operands = 0 : i64, tpu.core_type = #tpu.core_type<tc>, window_params = [{transform_indices = @transform_0, window_bounds = array<i64: 256, 8>}, {pipeline_mode = #tpu.pipeline_mode<synchronous>, transform_indices = @transform_1, window_bounds = array<i64: 1, 8>}, {pipeline_mode = #tpu.pipeline_mode<synchronous>, transform_indices = @transform_2, window_bounds = array<i64: 1, 8>}, {pipeline_mode = #tpu.pipeline_mode<synchronous>, transform_indices = @transform_3, window_bounds = array<i64: 8, 32>}, {pipeline_mode = #tpu.pipeline_mode<synchronous>, transform_indices = @transform_4, window_bounds = array<i64: 1, 32>}, {pipeline_mode = #tpu.pipeline_mode<synchronous>, transform_indices = @transform_5, window_bounds = array<i64: 32, 64>}, {pipeline_mode = #tpu.pipeline_mode<synchronous>, transform_indices = @transform_6, window_bounds = array<i64: 1, 64>}, {transform_indices = @transform_7, window_bounds = array<i64: 256, 64>}]} {
    %c0 = arith.constant 0 : index
    %c0_0 = arith.constant 0 : index
    %0 = vector.load %arg1[%c0, %c0_0] : memref<256x8xbf16, #tpu.memory_space<vmem>>, vector<256x8xbf16>
    %1 = arith.extf %0 : vector<256x8xbf16> to vector<256x8xf32>
    %c0_1 = arith.constant 0 : index
    %c0_2 = arith.constant 0 : index
    %2 = vector.load %arg2[%c0_1, %c0_2] : memref<1x8xf32, #tpu.memory_space<vmem>>, vector<1x8xf32>
    %3 = vector.broadcast %2 : vector<1x8xf32> to vector<256x8xf32>
    %4 = arith.mulf %1, %3 : vector<256x8xf32>
    %c0_3 = arith.constant 0 : index
    %c0_4 = arith.constant 0 : index
    %5 = vector.load %arg3[%c0_3, %c0_4] : memref<1x8xf32, #tpu.memory_space<vmem>>, vector<1x8xf32>
    %6 = vector.broadcast %5 : vector<1x8xf32> to vector<256x8xf32>
    %7 = arith.addf %4, %6 : vector<256x8xf32>
    %8 = arith.truncf %7 : vector<256x8xf32> to vector<256x8xbf16>
    %c0_5 = arith.constant 0 : index
    %c0_6 = arith.constant 0 : index
    %9 = vector.load %arg4[%c0_5, %c0_6] : memref<8x32xbf16, #tpu.memory_space<vmem>>, vector<8x32xbf16>
    %cst = arith.constant dense<0.000000e+00> : vector<256x32xf32>
    %10 = tpu.matmul %8, %9, %cst {dimension_numbers = #tpu.dot_dimension_numbers<[1], [0], [0], [1], [0, 0, 1, 1], [], []>} : vector<256x8xbf16>, vector<8x32xbf16>, vector<256x32xf32> -> vector<256x32xf32>
    %c0_7 = arith.constant 0 : index
    %c0_8 = arith.constant 0 : index
    %11 = vector.load %arg5[%c0_7, %c0_8] : memref<1x32xf32, #tpu.memory_space<vmem>>, vector<1x32xf32>
    %12 = vector.broadcast %11 : vector<1x32xf32> to vector<256x32xf32>
    %13 = arith.addf %10, %12 : vector<256x32xf32>
    %cst_9 = arith.constant 0.000000e+00 : f32
    %14 = vector.broadcast %cst_9 : f32 to vector<256x32xf32>
    %15 = arith.maximumf %13, %14 : vector<256x32xf32>
    %16 = arith.truncf %15 : vector<256x32xf32> to vector<256x32xbf16>
    %c0_10 = arith.constant 0 : index
    %c0_11 = arith.constant 0 : index
    %17 = vector.load %arg6[%c0_10, %c0_11] : memref<32x64xbf16, #tpu.memory_space<vmem>>, vector<32x64xbf16>
    %cst_12 = arith.constant dense<0.000000e+00> : vector<256x64xf32>
    %18 = tpu.matmul %16, %17, %cst_12 {dimension_numbers = #tpu.dot_dimension_numbers<[1], [0], [0], [1], [0, 0, 1, 1], [], []>} : vector<256x32xbf16>, vector<32x64xbf16>, vector<256x64xf32> -> vector<256x64xf32>
    %c0_13 = arith.constant 0 : index
    %c0_14 = arith.constant 0 : index
    %19 = vector.load %arg7[%c0_13, %c0_14] : memref<1x64xf32, #tpu.memory_space<vmem>>, vector<1x64xf32>
    %20 = vector.broadcast %19 : vector<1x64xf32> to vector<256x64xf32>
    %21 = arith.addf %18, %20 : vector<256x64xf32>
    %c0_15 = arith.constant 0 : index
    %c0_16 = arith.constant 0 : index
    %22 = vector.load %arg8[%c0_15, %c0_16] : memref<256x64xf32, #tpu.memory_space<vmem>>, vector<256x64xf32>
    tpu.vector_store %arg8[%c0_15, %c0_16], %21 {strides = array<i32>} : memref<256x64xf32, #tpu.memory_space<vmem>>, vector<256x64xf32>,
    return
  }
  func.func @transform_0(%arg0: i32) -> (i32, i32) {
    %c0_i32 = arith.constant 0 : i32
    %c0_i32_0 = arith.constant 0 : i32
    return %arg0, %c0_i32 : i32, i32
  }
  func.func @transform_1(%arg0: i32) -> (i32, i32) {
    %c0_i32 = arith.constant 0 : i32
    %c0_i32_0 = arith.constant 0 : i32
    %c0_i32_1 = arith.constant 0 : i32
    return %c0_i32, %c0_i32_0 : i32, i32
  }
  func.func @transform_2(%arg0: i32) -> (i32, i32) {
    %c0_i32 = arith.constant 0 : i32
    %c0_i32_0 = arith.constant 0 : i32
    %c0_i32_1 = arith.constant 0 : i32
    return %c0_i32, %c0_i32_0 : i32, i32
  }
  func.func @transform_3(%arg0: i32) -> (i32, i32) {
    %c0_i32 = arith.constant 0 : i32
    %c0_i32_0 = arith.constant 0 : i32
    %c0_i32_1 = arith.constant 0 : i32
    return %c0_i32, %c0_i32_0 : i32, i32
  }
  func.func @transform_4(%arg0: i32) -> (i32, i32) {
    %c0_i32 = arith.constant 0 : i32
    %c0_i32_0 = arith.constant 0 : i32
    %c0_i32_1 = arith.constant 0 : i32
    return %c0_i32, %c0_i32_0 : i32, i32
  }
  func.func @transform_5(%arg0: i32) -> (i32, i32) {
    %c0_i32 = arith.constant 0 : i32
    %c0_i32_0 = arith.constant 0 : i32
    %c0_i32_1 = arith.constant 0 : i32
    return %c0_i32, %c0_i32_0 : i32, i32
  }
  func.func @transform_6(%arg0: i32) -> (i32, i32) {
    %c0_i32 = arith.constant 0 : i32
    %c0_i32_0 = arith.constant 0 : i32
    %c0_i32_1 = arith.constant 0 : i32
    return %c0_i32, %c0_i32_0 : i32, i32
  }
  func.func @transform_7(%arg0: i32) -> (i32, i32) {
    %c0_i32 = arith.constant 0 : i32
    %c0_i32_0 = arith.constant 0 : i32
    return %arg0, %c0_i32 : i32, i32
  }
}

module attributes {stable_mosaic.version = 11 : i64} {
  func.func @encode_stats_kernel(%arg0: i32, %arg1: memref<256x64xf32, #tpu.memory_space<vmem>>, %arg2: memref<64x32xbf16, #tpu.memory_space<vmem>>, %arg3: memref<1x32xf32, #tpu.memory_space<vmem>>, %arg4: memref<32x8xbf16, #tpu.memory_space<vmem>>, %arg5: memref<1x8xf32, #tpu.memory_space<vmem>>, %arg6: memref<256x8xbf16, #tpu.memory_space<vmem>>, %arg7: memref<1x1x16xf32, #tpu.memory_space<vmem>>) attributes {dimension_semantics = [#tpu.dimension_semantics<parallel>], iteration_bounds = array<i64: 2>, scalar_prefetch = 0 : i64, scratch_operands = 0 : i64, tpu.core_type = #tpu.core_type<tc>, window_params = [{transform_indices = @transform_0, window_bounds = array<i64: 256, 64>}, {pipeline_mode = #tpu.pipeline_mode<synchronous>, transform_indices = @transform_1, window_bounds = array<i64: 64, 32>}, {pipeline_mode = #tpu.pipeline_mode<synchronous>, transform_indices = @transform_2, window_bounds = array<i64: 1, 32>}, {pipeline_mode = #tpu.pipeline_mode<synchronous>, transform_indices = @transform_3, window_bounds = array<i64: 32, 8>}, {pipeline_mode = #tpu.pipeline_mode<synchronous>, transform_indices = @transform_4, window_bounds = array<i64: 1, 8>}, {transform_indices = @transform_5, window_bounds = array<i64: 256, 8>}, {transform_indices = @transform_6, window_bounds = array<i64: 1, 1, 16>}]} {
    %c0 = arith.constant 0 : index
    %c0_0 = arith.constant 0 : index
    %0 = vector.load %arg1[%c0, %c0_0] : memref<256x64xf32, #tpu.memory_space<vmem>>, vector<256x64xf32>
    %1 = arith.truncf %0 : vector<256x64xf32> to vector<256x64xbf16>
    %c0_1 = arith.constant 0 : index
    %c0_2 = arith.constant 0 : index
    %2 = vector.load %arg2[%c0_1, %c0_2] : memref<64x32xbf16, #tpu.memory_space<vmem>>, vector<64x32xbf16>
    %cst = arith.constant dense<0.000000e+00> : vector<256x32xf32>
    %3 = tpu.matmul %1, %2, %cst {dimension_numbers = #tpu.dot_dimension_numbers<[1], [0], [0], [1], [0, 0, 1, 1], [], []>} : vector<256x64xbf16>, vector<64x32xbf16>, vector<256x32xf32> -> vector<256x32xf32>
    %c0_3 = arith.constant 0 : index
    %c0_4 = arith.constant 0 : index
    %4 = vector.load %arg3[%c0_3, %c0_4] : memref<1x32xf32, #tpu.memory_space<vmem>>, vector<1x32xf32>
    %5 = vector.broadcast %4 : vector<1x32xf32> to vector<256x32xf32>
    %6 = arith.addf %3, %5 : vector<256x32xf32>
    %cst_5 = arith.constant 0.000000e+00 : f32
    %7 = vector.broadcast %cst_5 : f32 to vector<256x32xf32>
    %8 = arith.maximumf %6, %7 : vector<256x32xf32>
    %9 = arith.truncf %8 : vector<256x32xf32> to vector<256x32xbf16>
    %c0_6 = arith.constant 0 : index
    %c0_7 = arith.constant 0 : index
    %10 = vector.load %arg4[%c0_6, %c0_7] : memref<32x8xbf16, #tpu.memory_space<vmem>>, vector<32x8xbf16>
    %cst_8 = arith.constant dense<0.000000e+00> : vector<256x8xf32>
    %11 = tpu.matmul %9, %10, %cst_8 {dimension_numbers = #tpu.dot_dimension_numbers<[1], [0], [0], [1], [0, 0, 1, 1], [], []>} : vector<256x32xbf16>, vector<32x8xbf16>, vector<256x8xf32> -> vector<256x8xf32>
    %c0_9 = arith.constant 0 : index
    %c0_10 = arith.constant 0 : index
    %12 = vector.load %arg5[%c0_9, %c0_10] : memref<1x8xf32, #tpu.memory_space<vmem>>, vector<1x8xf32>
    %13 = vector.broadcast %12 : vector<1x8xf32> to vector<256x8xf32>
    %14 = arith.addf %11, %13 : vector<256x8xf32>
    %15 = arith.truncf %14 : vector<256x8xf32> to vector<256x8xbf16>
    %c0_11 = arith.constant 0 : index
    %c0_12 = arith.constant 0 : index
    %16 = vector.load %arg6[%c0_11, %c0_12] : memref<256x8xbf16, #tpu.memory_space<vmem>>, vector<256x8xbf16>
    tpu.vector_store %arg6[%c0_11, %c0_12], %15 {strides = array<i32>} : memref<256x8xbf16, #tpu.memory_space<vmem>>, vector<256x8xbf16>,
    %c256_i32 = arith.constant 256 : i32
    %17 = arith.muli %arg0, %c256_i32 : i32
    %c512_i32 = arith.constant 512 : i32
    %18 = arith.subi %c512_i32, %17 : i32
    %c256_i32_13 = arith.constant 256 : i32
    %19 = arith.minsi %18, %c256_i32_13 : i32
    %20 = arith.sitofp %19 : i32 to f32
    %21 = tpu.iota {dimensions = array<i32: 0>} : vector<256x8xi32>
    %22 = vector.broadcast %18 : i32 to vector<256x8xi32>
    %23 = arith.cmpi slt, %21, %22 : vector<256x8xi32>
    %cst_14 = arith.constant 0.000000e+00 : f32
    %24 = vector.broadcast %cst_14 : f32 to vector<256x8xf32>
    %25 = arith.select %23, %14, %24 : vector<256x8xi1>, vector<256x8xf32>
    %cst_15 = arith.constant dense<0.000000e+00> : vector<8xf32>
    %26 = vector.multi_reduction <add>, %25, %cst_15 [0] : vector<256x8xf32> to vector<8xf32>
    %27 = vector.shape_cast %26 : vector<8xf32> to vector<1x8xf32>
    %28 = vector.broadcast %20 : f32 to vector<1x8xf32>
    %29 = arith.divf %27, %28 : vector<1x8xf32>
    %30 = vector.broadcast %29 : vector<1x8xf32> to vector<256x8xf32>
    %31 = arith.subf %14, %30 : vector<256x8xf32>
    %cst_16 = arith.constant 0.000000e+00 : f32
    %32 = vector.broadcast %cst_16 : f32 to vector<256x8xf32>
    %33 = arith.select %23, %31, %32 : vector<256x8xi1>, vector<256x8xf32>
    %34 = arith.mulf %33, %33 : vector<256x8xf32>
    %cst_17 = arith.constant dense<0.000000e+00> : vector<8xf32>
    %35 = vector.multi_reduction <add>, %34, %cst_17 [0] : vector<256x8xf32> to vector<8xf32>
    %36 = vector.shape_cast %35 : vector<8xf32> to vector<1x8xf32>
    %37 = tpu.concatenate %27, %36 in 1 : vector<1x8xf32>, vector<1x8xf32> -> vector<1x16xf32>
    %38 = vector.shape_cast %37 : vector<1x16xf32> to vector<1x1x16xf32>
    %c0_18 = arith.constant 0 : index
    %c0_19 = arith.constant 0 : index
    %c0_20 = arith.constant 0 : index
    %39 = vector.load %arg7[%c0_18, %c0_19, %c0_20] : memref<1x1x16xf32, #tpu.memory_space<vmem>>, vector<1x1x16xf32>
    tpu.vector_store %arg7[%c0_18, %c0_19, %c0_20], %38 {strides = array<i32>} : memref<1x1x16xf32, #tpu.memory_space<vmem>>, vector<1x1x16xf32>,
    return
  }
  func.func @transform_0(%arg0: i32) -> (i32, i32) {
    %c0_i32 = arith.constant 0 : i32
    %c0_i32_0 = arith.constant 0 : i32
    return %arg0, %c0_i32 : i32, i32
  }
  func.func @transform_1(%arg0: i32) -> (i32, i32) {
    %c0_i32 = arith.constant 0 : i32
    %c0_i32_0 = arith.constant 0 : i32
    %c0_i32_1 = arith.constant 0 : i32
    return %c0_i32, %c0_i32_0 : i32, i32
  }
  func.func @transform_2(%arg0: i32) -> (i32, i32) {
    %c0_i32 = arith.constant 0 : i32
    %c0_i32_0 = arith.constant 0 : i32
    %c0_i32_1 = arith.constant 0 : i32
    return %c0_i32, %c0_i32_0 : i32, i32
  }
  func.func @transform_3(%arg0: i32) -> (i32, i32) {
    %c0_i32 = arith.constant 0 : i32
    %c0_i32_0 = arith.constant 0 : i32
    %c0_i32_1 = arith.constant 0 : i32
    return %c0_i32, %c0_i32_0 : i32, i32
  }
  func.func @transform_4(%arg0: i32) -> (i32, i32) {
    %c0_i32 = arith.constant 0 : i32
    %c0_i32_0 = arith.constant 0 : i32
    %c0_i32_1 = arith.constant 0 : i32
    return %c0_i32, %c0_i32_0 : i32, i32
  }
  func.func @transform_5(%arg0: i32) -> (i32, i32) {
    %c0_i32 = arith.constant 0 : i32
    %c0_i32_0 = arith.constant 0 : i32
    return %arg0, %c0_i32 : i32, i32
  }
  func.func @transform_6(%arg0: i32) -> (i32, i32, i32) {
    %c0_i32 = arith.constant 0 : i32
    %c0_i32_0 = arith.constant 0 : i32
    %c0_i32_1 = arith.constant 0 : i32
    return %arg0, %c0_i32, %c0_i32_0 : i32, i32, i32
  }
}

</mosaic_0001>

<bundles_post_ra>
// kernel: autoencoder_forward.3
= control target key start
LH: loop header
LB: loop body
LE: loop exit
PB: predicated region body
PF: predicated region fallthrough
CT: control target
= control target key end

     0   :  { %s1325_s24 = smov 0   ;;  %s1619_s0 = inlined_call_operand.vmem [shape: bf16[512,8], index: 0, kind: input, shape index: {}]   ;;  %s1620_s1 = inlined_call_operand.vmem [shape: f32[1,8], index: 1, kind: input, shape index: {}]   ;;  %s1621_s2 = inlined_call_operand.vmem [shape: f32[1,8], index: 2, kind: input, shape index: {}]   ;;  %s1622_s3 = inlined_call_operand.vmem [shape: bf16[8,32], index: 3, kind: input, shape index: {}]   ;;  %s1623_s4 = inlined_call_operand.vmem [shape: f32[1,32], index: 4, kind: input, shape index: {}]   ;;  %s1624_s5 = inlined_call_operand.vmem [shape: bf16[32,64], index: 5, kind: input, shape index: {}]   ;;  %s1625_s6 = inlined_call_operand.vmem [shape: f32[1,64], index: 6, kind: input, shape index: {}]   ;;  %s1626_s7 = inlined_call_operand.vmem [shape: f32[512,64], index: 7, kind: output, shape index: {}]  }
   0x1 LB: > { %s1033_s25 = sadd.s32 4294967295, %s1283_s24   ;;  %p1037_p0 = scmp.ge.s32.totalorder %s1283_s24, 1  ;;  %s1283_s24 = sphi %s1325_s24, %s17_s24  }
   0x2   : > { %p238_p1 = scmp.lt.s32.totalorder %s1283_s24, 3 }
   0x4   : > { %p239_p2 = pnand %p1037_p0, %p238_p1 }
   0x5   : > { %s1038_s28 = sshll.u32 (!%p239_p2), %s1033_s25, 5 }
   0x6   : > { %242 = sbr.rel (%p239_p2) target bundleno = 488 (0x1e8), region = 48  ;;  %p271_p3 = scmp.lt.s32.totalorder (!%p239_p2), %s1038_s28, 63 }
   0xb   : > { %v441_v0 = vld [vmem:[%s1622_s3] sm:$0xf]  ;;  %vm498_vm0 = vcmask 1043456   ;;  %s1628_s28 = smov (!%p271_p3, %s1038_s28), 63  ;;  %vm449_vm1 = vcmask 64512   ;;  %vm734_vm2 = vcmask 261120  }
   0xc   : > { %1266 = vmatprep.subr.msk.bf16.mxu0 %vm498_vm0, %v441_v0  ;;  %v500_v1 = vsel %vm498_vm0, %v441_v0, 0  ;;  %s1039_s29 = sshll.u32 %s1628_s28, 2  ;;  %v1347_v2 = vld [vmem:[%s1620_s1] ss:$0 sm:$0xff]  ;;  %s1041_s20 = sshll.u32 %s1628_s28, 3  ;;  %vm944_vm3 = vcmask 523264  }
   0xd   : > { %1197 = vmatpush3.bf16.msra.mxu0 %v500_v1  ;;  %s1342_s9 = scalar_lea.vmem %s1619_s0, %s1039_s29  ;;  %v1356_v11 = vld [vmem:[%s1621_s2] ss:$0 sm:$0xff]  ;;  %s1518_s26 = scalar_lea.vmem %s1626_s7, %s1041_s20 }
   0xe   : > { %v1083_v3 = vld [vmem:[%s1342_s9] sm:$0xff]   ;;  %v1146_v4 = vld [vmem:[%s1342_s9 + $0x8] sm:$0xff]   ;;  %v1147_v5 = vld [vmem:[%s1342_s9 + $0x10] sm:$0xff]  }
   0xf   : > { %v1084_v6 = vunpack.c.l.bf16 %v1083_v3  ;;  %v1085_v7 = vunpack.c.h.bf16 %v1083_v3  ;;  %v1088_v8 = vunpack.c.l.bf16 %v1146_v4  ;;  %v1089_v9 = vunpack.c.h.bf16 %v1146_v4  ;;  %v1148_v10 = vld [vmem:[%s1342_s9 + $0x18] sm:$0xff]   ;;  %v1149_v22 = vld [vmem:[%s1342_s9 + $0x20] sm:$0xff]   ;;  %v1150_v35 = vld [vmem:[%s1342_s9 + $0x28] sm:$0xff]  }
  0x10   : > { %v1092_v12 = vunpack.c.l.bf16 %v1147_v5  ;;  %v1093_v13 = vunpack.c.h.bf16 %v1147_v5  ;;  %v1096_v14 = vunpack.c.l.bf16 %v1148_v10  ;;  %v1097_v15 = vunpack.c.h.bf16 %v1148_v10  ;;  %v1151_v37 = vld [vmem:[%s1342_s9 + $0x30] sm:$0xff]   ;;  %v1152_v54 = vld [vmem:[%s1342_s9 + $0x38] sm:$0xff]   ;;  %v1153_v55 = vld [vmem:[%s1342_s9 + $0x40] sm:$0xff]  }
  0x11   : > { %v354_v16 = vmul.f32 %v1084_v6, %v1347_v2  ;;  %v355_v17 = vmul.f32 %v1085_v7, %v1347_v2  ;;  %v356_v18 = vmul.f32 %v1088_v8, %v1347_v2  ;;  %v357_v19 = vmul.f32 %v1089_v9, %v1347_v2  ;;  %v1154_v7 = vld [vmem:[%s1342_s9 + $0x48] sm:$0xff]   ;;  %v1155_v8 = vld [vmem:[%s1342_s9 + $0x50] sm:$0xff]  }
  0x12   : > { %v358_v20 = vmul.f32 %v1092_v12, %v1347_v2  ;;  %v359_v21 = vmul.f32 %v1093_v13, %v1347_v2  ;;  %v360_v29 = vmul.f32 %v1096_v14, %v1347_v2  ;;  %v361_v30 = vmul.f32 %v1097_v15, %v1347_v2 }
  0x13   : > { %v393_v23 = vadd.f32 %v1356_v11, %v354_v16  ;;  %v394_v24 = vadd.f32 %v1356_v11, %v355_v17  ;;  %v395_v25 = vadd.f32 %v1356_v11, %v356_v18  ;;  %v396_v26 = vadd.f32 %v1356_v11, %v357_v19 }
  0x14   : > { %v397_v27 = vadd.f32 %v1356_v11, %v358_v20  ;;  %v398_v28 = vadd.f32 %v1356_v11, %v359_v21  ;;  %v1100_v33 = vunpack.c.l.bf16 %v1149_v22  ;;  %v1101_v34 = vunpack.c.h.bf16 %v1149_v22 }
  0x15   : > { %v425_v31 = vpack.c.bf16 %v394_v24, %v393_v23  ;;  %v426_v32 = vpack.c.bf16 %v396_v26, %v395_v25  ;;  %v399_v40 = vadd.f32 %v1356_v11, %v360_v29  ;;  %v400_v41 = vadd.f32 %v1356_v11, %v361_v30  ;;  %v1156_v24 = vld [vmem:[%s1342_s9 + $0x58] sm:$0xff]   ;;  %v1157_v25 = vld [vmem:[%s1342_s9 + $0x60] sm:$0xff]  }
  0x16   : > { %v427_v36 = vpack.c.bf16 %v398_v28, %v397_v27  ;;  %v362_v38 = vmul.f32 %v1100_v33, %v1347_v2  ;;  %v363_v39 = vmul.f32 %v1101_v34, %v1347_v2  ;;  %v1104_v42 = vunpack.c.l.bf16 %v1150_v35 }
  0x17   : > { %1198 = vmatprep.mubr.msk.bf16.mxu0 %vm449_vm1, %v425_v31  ;;  %v1105_v43 = vunpack.c.h.bf16 %v1150_v35  ;;  %v1108_v46 = vunpack.c.l.bf16 %v1151_v37  ;;  %v1109_v47 = vunpack.c.h.bf16 %v1151_v37  ;;  %v428_v48 = vpack.c.bf16 %v400_v41, %v399_v40  ;;  %v1158_v40 = vld [vmem:[%s1342_s9 + $0x68] sm:$0xff]   ;;  %v1159_v41 = vld [vmem:[%s1342_s9 + $0x70] sm:$0xff]  }
  0x18   : > { %1199 = vmatmul.mubr.msk.bf16.vlgmr.msra.gmra.mxu0 %vm449_vm1, %v426_v32  ;;  %v401_v44 = vadd.f32 %v1356_v11, %v362_v38  ;;  %v402_v45 = vadd.f32 %v1356_v11, %v363_v39  ;;  %v364_v49 = vmul.f32 %v1104_v42, %v1347_v2  ;;  %v1112_v58 = vunpack.c.l.bf16 %v1152_v54 }
  0x19   : > { %1202 = vmatprep.mubr.msk.bf16.mxu0 %vm449_vm1, %v427_v36  ;;  %v365_v50 = vmul.f32 %v1105_v43, %v1347_v2  ;;  %v366_v52 = vmul.f32 %v1108_v46, %v1347_v2  ;;  %v367_v53 = vmul.f32 %v1109_v47, %v1347_v2  ;;  %v1113_v59 = vunpack.c.h.bf16 %v1152_v54 }
  0x1a   : > { %v429_v51 = vpack.c.bf16 %v402_v45, %v401_v44  ;;  %v403_v56 = vadd.f32 %v1356_v11, %v364_v49  ;;  %v1116_v62 = vunpack.c.l.bf16 %v1153_v55  ;;  %v1117_v63 = vunpack.c.h.bf16 %v1153_v55 }
  0x1b   : > { %v404_v57 = vadd.f32 %v1356_v11, %v365_v50  ;;  %v405_v60 = vadd.f32 %v1356_v11, %v366_v52  ;;  %v406_v61 = vadd.f32 %v1356_v11, %v367_v53  ;;  %v368_v1 = vmul.f32 %v1112_v58, %v1347_v2 }
  0x1c   : > { %v369_v3 = vmul.f32 %v1113_v59, %v1347_v2  ;;  %v370_v5 = vmul.f32 %v1116_v62, %v1347_v2  ;;  %v371_v6 = vmul.f32 %v1117_v63, %v1347_v2  ;;  %v1120_v12 = vunpack.c.l.bf16 %v1154_v7 }
  0x1d   : > { %v430_v0 = vpack.c.bf16 %v404_v57, %v403_v56  ;;  %v431_v4 = vpack.c.bf16 %v406_v61, %v405_v60  ;;  %v407_v9 = vadd.f32 %v1356_v11, %v368_v1  ;;  %v1121_v13 = vunpack.c.h.bf16 %v1154_v7  ;;  %v1160_v56 = vld [vmem:[%s1342_s9 + $0x78] sm:$0xff]   ;;  %v1275_v7 = vld [vmem:[%s1624_s5 + $0x8] sm:$0xff]  }
  0x1e   : > { %v408_v10 = vadd.f32 %v1356_v11, %v369_v3  ;;  %v409_v14 = vadd.f32 %v1356_v11, %v370_v5  ;;  %v410_v15 = vadd.f32 %v1356_v11, %v371_v6  ;;  %v1124_v16 = vunpack.c.l.bf16 %v1155_v8  ;;  %1230 = vmatprep.subr.bf16.mxu1 %v1275_v7 }
  0x1f   : > { %v1125_v17 = vunpack.c.h.bf16 %v1155_v8  ;;  %v372_v19 = vmul.f32 %v1120_v12, %v1347_v2  ;;  %v373_v20 = vmul.f32 %v1121_v13, %v1347_v2  ;;  %v1128_v28 = vunpack.c.l.bf16 %v1156_v24  ;;  %1231 = vmatpush3.bf16.msra.mxu1 %v1275_v7 }
  0x20   : > { %1203 = vmatmul.mubr.msk.bf16.gmra.mxu0 %vm449_vm1, %v428_v48  ;;  %v432_v18 = vpack.c.bf16 %v408_v10, %v407_v9  ;;  %v433_v21 = vpack.c.bf16 %v410_v15, %v409_v14  ;;  %v374_v22 = vmul.f32 %v1124_v16, %v1347_v2  ;;  %v1129_v29 = vunpack.c.h.bf16 %v1156_v24 }
  0x21   : > { %1206 = vmatprep.mubr.msk.bf16.mxu0 %vm449_vm1, %v429_v51  ;;  %v375_v23 = vmul.f32 %v1125_v17, %v1347_v2  ;;  %v411_v26 = vadd.f32 %v1356_v11, %v372_v19  ;;  %v412_v27 = vadd.f32 %v1356_v11, %v373_v20  ;;  %v1132_v32 = vunpack.c.l.bf16 %v1157_v25 }
  0x22   : > { %v413_v30 = vadd.f32 %v1356_v11, %v374_v22  ;;  %v1133_v33 = vunpack.c.h.bf16 %v1157_v25  ;;  %v376_v35 = vmul.f32 %v1128_v28, %v1347_v2  ;;  %v377_v36 = vmul.f32 %v1129_v29, %v1347_v2 }
  0x23   : > { %v414_v31 = vadd.f32 %v1356_v11, %v375_v23  ;;  %v434_v34 = vpack.c.bf16 %v412_v27, %v411_v26  ;;  %v378_v38 = vmul.f32 %v1132_v32, %v1347_v2  ;;  %v1136_v44 = vunpack.c.l.bf16 %v1158_v40 }
  0x24   : > { %v379_v39 = vmul.f32 %v1133_v33, %v1347_v2  ;;  %v415_v42 = vadd.f32 %v1356_v11, %v376_v35  ;;  %v416_v43 = vadd.f32 %v1356_v11, %v377_v36  ;;  %v1137_v45 = vunpack.c.h.bf16 %v1158_v40 }
  0x25   : > { %v435_v37 = vpack.c.bf16 %v414_v31, %v413_v30  ;;  %v417_v46 = vadd.f32 %v1356_v11, %v378_v38  ;;  %v1140_v48 = vunpack.c.l.bf16 %v1159_v41  ;;  %v1141_v49 = vunpack.c.h.bf16 %v1159_v41 }
  0x26   : > { %v418_v47 = vadd.f32 %v1356_v11, %v379_v39  ;;  %v436_v50 = vpack.c.bf16 %v416_v43, %v415_v42  ;;  %v380_v51 = vmul.f32 %v1136_v44, %v1347_v2  ;;  %v381_v52 = vmul.f32 %v1137_v45, %v1347_v2 }
  0x27   : > { %v382_v54 = vmul.f32 %v1140_v48, %v1347_v2  ;;  %v383_v55 = vmul.f32 %v1141_v49, %v1347_v2  ;;  %v1144_v59 = vunpack.c.l.bf16 %v1160_v56  ;;  %v1145_v60 = vunpack.c.h.bf16 %v1160_v56 }
  0x28   : > { %1207 = vmatmul.mubr.msk.bf16.gmra.mxu0 %vm449_vm1, %v430_v0  ;;  %v437_v53 = vpack.c.bf16 %v418_v47, %v417_v46  ;;  %v419_v57 = vadd.f32 %v1356_v11, %v380_v51  ;;  %v420_v58 = vadd.f32 %v1356_v11, %v381_v52 }
  0x29   : > { %1210 = vmatprep.mubr.msk.bf16.mxu0 %vm449_vm1, %v431_v4  ;;  %v421_v61 = vadd.f32 %v1356_v11, %v382_v54  ;;  %v422_v62 = vadd.f32 %v1356_v11, %v383_v55  ;;  %v384_v0 = vmul.f32 %v1144_v59, %v1347_v2  ;;  %v385_v1 = vmul.f32 %v1145_v60, %v1347_v2  ;;  %v1276_v2 = vld [vmem:[%s1624_s5] sm:$0xff]  }
  0x2a   : > { %v438_v63 = vpack.c.bf16 %v420_v58, %v419_v57  ;;  %1232 = vmatprep.subr.bf16.mxu1 %v1276_v2 }
  0x2b   : > { %v439_v3 = vpack.c.bf16 %v422_v62, %v421_v61  ;;  %v423_v4 = vadd.f32 %v1356_v11, %v384_v0  ;;  %v424_v5 = vadd.f32 %v1356_v11, %v385_v1  ;;  %1233 = vmatpush3.bf16.msra.mxu1 %v1276_v2  ;;  %v1459_v11 = vld [vmem:[%s1623_s4] ss:$0 sm:$0xff] }
  0x2d   : > { %v440_v6 = vpack.c.bf16 %v424_v5, %v423_v4 }
  0x30   : > { %1211 = vmatmul.mubr.msk.bf16.gmra.mxu0 %vm449_vm1, %v432_v18 }
  0x31   : > { %1214 = vmatprep.mubr.msk.bf16.mxu0 %vm449_vm1, %v433_v21 }
  0x38   : > { %1215 = vmatmul.mubr.msk.bf16.gmra.mxu0 %vm449_vm1, %v434_v34 }
  0x39   : > { %1218 = vmatprep.mubr.msk.bf16.mxu0 %vm449_vm1, %v435_v37 }
  0x40   : > { %1219 = vmatmul.mubr.msk.bf16.gmra.mxu0 %vm449_vm1, %v436_v50 }
  0x41   : > { %1222 = vmatprep.mubr.msk.bf16.mxu0 %vm449_vm1, %v437_v53 }
  0x48   : > { %1223 = vmatmul.mubr.msk.bf16.gmra.mxu0 %vm449_vm1, %v438_v63 }
  0x49   : > { %1226 = vmatprep.mubr.msk.bf16.mxu0 %vm449_vm1, %v439_v3 }
  0x50   : > { %1227 = vmatmul.mubr.msk.bf16.gmra.mxu0 %vm449_vm1, %v440_v6 }
  0xd8   : > { %v1200_v8 = vpop.f32.mrf.mxu0 }
  0xd9   : > { %v545_v14 = vadd.f32 %v1200_v8, %v1459_v11 }
  0xda   : > { %v536_v9 = vpop.f32.mrf.mxu0 }
  0xdb   : > { %v537_v12 = vadd.f32 %v1459_v11, %v536_v9  ;;  %v665_v21 = vmax.f32 %v545_v14, 0.0 }
  0xdc   : > { %v1201_v10 = vpop.f32.mrf.mxu0 }
  0xdd   : > { %v548_v13 = vadd.f32 %v1201_v10, %v1459_v11  ;;  %v663_v19 = vmax.f32 %v537_v12, 0.0 }
  0xde   : > { %v539_v15 = vpop.f32.mrf.mxu0 }
  0xdf   : > { %v540_v16 = vadd.f32 %v1459_v11, %v539_v15  ;;  %v666_v17 = vmax.f32 %v548_v13, 0.0 }
  0xe0   : > { %v1204_v18 = vpop.f32.mrf.mxu0 }
  0xe1   : > { %v664_v20 = vmax.f32 %v540_v16, 0.0  ;;  %v696_v24 = vpack.c.bf16 %v666_v17, %v665_v21  ;;  %v561_v28 = vadd.f32 %v1204_v18, %v1459_v11 }
  0xe2   : > { %v552_v22 = vpop.f32.mrf.mxu0 }
  0xe3   : > { %v695_v23 = vpack.c.bf16 %v664_v20, %v663_v19  ;;  %v553_v26 = vadd.f32 %v1459_v11, %v552_v22  ;;  %v669_v35 = vmax.f32 %v561_v28, 0.0 }
  0xe4   : > { %v1205_v25 = vpop.f32.mrf.mxu0 }
  0xe5   : > { %v564_v27 = vadd.f32 %v1205_v25, %v1459_v11  ;;  %1234 = vmatprep.mubr.msk.bf16.mxu1 %vm734_vm2, %v695_v23  ;;  %v667_v33 = vmax.f32 %v553_v26, 0.0 }
  0xe6   : > { %v555_v29 = vpop.f32.mrf.mxu0  ;;  %1235 = vmatmul.mubr.msk.bf16.vlgmr.msra.gmra.mxu1 %vm734_vm2, %v696_v24 }
  0xe7   : > { %v556_v30 = vadd.f32 %v1459_v11, %v555_v29  ;;  %v670_v31 = vmax.f32 %v564_v27, 0.0 }
  0xe8   : > { %v1208_v32 = vpop.f32.mrf.mxu0 }
  0xe9   : > { %v668_v34 = vmax.f32 %v556_v30, 0.0  ;;  %v698_v38 = vpack.c.bf16 %v670_v31, %v669_v35  ;;  %v577_v42 = vadd.f32 %v1208_v32, %v1459_v11 }
  0xea   : > { %v568_v36 = vpop.f32.mrf.mxu0 }
  0xeb   : > { %v697_v37 = vpack.c.bf16 %v668_v34, %v667_v33  ;;  %v569_v40 = vadd.f32 %v1459_v11, %v568_v36  ;;  %v673_v49 = vmax.f32 %v577_v42, 0.0 }
  0xec   : > { %v1209_v39 = vpop.f32.mrf.mxu0 }
  0xed   : > { %v580_v41 = vadd.f32 %v1209_v39, %v1459_v11  ;;  %1238 = vmatprep.mubr.msk.bf16.mxu1 %vm734_vm2, %v697_v37  ;;  %v671_v47 = vmax.f32 %v569_v40, 0.0 }
  0xee   : > { %v571_v43 = vpop.f32.mrf.mxu0  ;;  %1239 = vmatmul.mubr.msk.bf16.gmra.mxu1 %vm734_vm2, %v698_v38 }
  0xef   : > { %v572_v44 = vadd.f32 %v1459_v11, %v571_v43  ;;  %v674_v45 = vmax.f32 %v580_v41, 0.0 }
  0xf0   : > { %v1212_v46 = vpop.f32.mrf.mxu0 }
  0xf1   : > { %v672_v48 = vmax.f32 %v572_v44, 0.0  ;;  %v700_v52 = vpack.c.bf16 %v674_v45, %v673_v49  ;;  %v593_v56 = vadd.f32 %v1212_v46, %v1459_v11 }
  0xf2   : > { %v584_v50 = vpop.f32.mrf.mxu0 }
  0xf3   : > { %v699_v51 = vpack.c.bf16 %v672_v48, %v671_v47  ;;  %v585_v54 = vadd.f32 %v1459_v11, %v584_v50  ;;  %v677_v63 = vmax.f32 %v593_v56, 0.0 }
  0xf4   : > { %v1213_v53 = vpop.f32.mrf.mxu0 }
  0xf5   : > { %v596_v55 = vadd.f32 %v1213_v53, %v1459_v11  ;;  %1242 = vmatprep.mubr.msk.bf16.mxu1 %vm734_vm2, %v699_v51  ;;  %v675_v61 = vmax.f32 %v585_v54, 0.0 }
  0xf6   : > { %v587_v57 = vpop.f32.mrf.mxu0  ;;  %1243 = vmatmul.mubr.msk.bf16.gmra.mxu1 %vm734_vm2, %v700_v52 }
  0xf7   : > { %v588_v58 = vadd.f32 %v1459_v11, %v587_v57  ;;  %v678_v59 = vmax.f32 %v596_v55, 0.0 }
  0xf8   : > { %v1216_v60 = vpop.f32.mrf.mxu0 }
  0xf9   : > { %v676_v62 = vmax.f32 %v588_v58, 0.0  ;;  %v702_v3 = vpack.c.bf16 %v678_v59, %v677_v63  ;;  %v609_v7 = vadd.f32 %v1216_v60, %v1459_v11  ;;  %v1513_v58 = vld [vmem:[%s1625_s6] ss:$0 sm:$0xff] }
  0xfa   : > { %v600_v0 = vpop.f32.mrf.mxu0 }
  0xfb   : > { %v701_v1 = vpack.c.bf16 %v676_v62, %v675_v61  ;;  %v601_v5 = vadd.f32 %v1459_v11, %v600_v0  ;;  %v681_v14 = vmax.f32 %v609_v7, 0.0 }
  0xfc   : > { %v1217_v4 = vpop.f32.mrf.mxu0 }
  0xfd   : > { %v612_v6 = vadd.f32 %v1217_v4, %v1459_v11  ;;  %1246 = vmatprep.mubr.msk.bf16.mxu1 %vm734_vm2, %v701_v1  ;;  %v679_v12 = vmax.f32 %v601_v5, 0.0 }
  0xfe   : > { %v603_v2 = vpop.f32.mrf.mxu0  ;;  %1247 = vmatmul.mubr.msk.bf16.gmra.mxu1 %vm734_vm2, %v702_v3 }
  0xff   : > { %v604_v8 = vadd.f32 %v1459_v11, %v603_v2  ;;  %v682_v9 = vmax.f32 %v612_v6, 0.0 }
 0x100   : > { %v1220_v10 = vpop.f32.mrf.mxu0 }
 0x101   : > { %v680_v13 = vmax.f32 %v604_v8, 0.0  ;;  %v704_v17 = vpack.c.bf16 %v682_v9, %v681_v14  ;;  %v625_v21 = vadd.f32 %v1220_v10, %v1459_v11 }
 0x102   : > { %v616_v15 = vpop.f32.mrf.mxu0 }
 0x103   : > { %v703_v16 = vpack.c.bf16 %v680_v13, %v679_v12  ;;  %v617_v19 = vadd.f32 %v1459_v11, %v616_v15  ;;  %v685_v28 = vmax.f32 %v625_v21, 0.0 }
 0x104   : > { %v1221_v18 = vpop.f32.mrf.mxu0 }
 0x105   : > { %v628_v20 = vadd.f32 %v1221_v18, %v1459_v11  ;;  %1250 = vmatprep.mubr.msk.bf16.mxu1 %vm734_vm2, %v703_v16  ;;  %v683_v26 = vmax.f32 %v617_v19, 0.0 }
 0x106   : > { %v619_v22 = vpop.f32.mrf.mxu0  ;;  %1251 = vmatmul.mubr.msk.bf16.gmra.mxu1 %vm734_vm2, %v704_v17 }
 0x107   : > { %v620_v23 = vadd.f32 %v1459_v11, %v619_v22  ;;  %v686_v24 = vmax.f32 %v628_v20, 0.0 }
 0x108   : > { %v1224_v25 = vpop.f32.mrf.mxu0 }
 0x109   : > { %v684_v27 = vmax.f32 %v620_v23, 0.0  ;;  %v706_v31 = vpack.c.bf16 %v686_v24, %v685_v28  ;;  %v641_v35 = vadd.f32 %v1224_v25, %v1459_v11 }
 0x10a   : > { %v632_v29 = vpop.f32.mrf.mxu0 }
 0x10b   : > { %v705_v30 = vpack.c.bf16 %v684_v27, %v683_v26  ;;  %v633_v33 = vadd.f32 %v1459_v11, %v632_v29  ;;  %v689_v42 = vmax.f32 %v641_v35, 0.0 }
 0x10c   : > { %v1225_v32 = vpop.f32.mrf.mxu0 }
 0x10d   : > { %v644_v34 = vadd.f32 %v1225_v32, %v1459_v11  ;;  %1254 = vmatprep.mubr.msk.bf16.mxu1 %vm734_vm2, %v705_v30  ;;  %v687_v40 = vmax.f32 %v633_v33, 0.0 }
 0x10e   : > { %v635_v36 = vpop.f32.mrf.mxu0  ;;  %1255 = vmatmul.mubr.msk.bf16.gmra.mxu1 %vm734_vm2, %v706_v31 }
 0x10f   : > { %v636_v37 = vadd.f32 %v1459_v11, %v635_v36  ;;  %v690_v38 = vmax.f32 %v644_v34, 0.0 }
 0x110   : > { %v1228_v39 = vpop.f32.mrf.mxu0 }
 0x111   : > { %v688_v41 = vmax.f32 %v636_v37, 0.0  ;;  %v708_v45 = vpack.c.bf16 %v690_v38, %v689_v42  ;;  %v657_v49 = vadd.f32 %v1228_v39, %v1459_v11 }
 0x112   : > { %v648_v43 = vpop.f32.mrf.mxu0 }
 0x113   : > { %v707_v44 = vpack.c.bf16 %v688_v41, %v687_v40  ;;  %v649_v47 = vadd.f32 %v1459_v11, %v648_v43  ;;  %v693_v55 = vmax.f32 %v657_v49, 0.0 }
 0x114   : > { %v1229_v46 = vpop.f32.mrf.mxu0 }
 0x115   : > { %v660_v48 = vadd.f32 %v1229_v46, %v1459_v11  ;;  %1258 = vmatprep.mubr.msk.bf16.mxu1 %vm734_vm2, %v707_v44  ;;  %v691_v53 = vmax.f32 %v649_v47, 0.0 }
 0x116   : > { %v651_v50 = vpop.f32.mrf.mxu0  ;;  %1259 = vmatmul.mubr.msk.bf16.gmra.mxu1 %vm734_vm2, %v708_v45 }
 0x117   : > { %v652_v51 = vadd.f32 %v1459_v11, %v651_v50  ;;  %v694_v52 = vmax.f32 %v660_v48, 0.0 }
 0x119   : > { %v692_v54 = vmax.f32 %v652_v51, 0.0  ;;  %v710_v57 = vpack.c.bf16 %v694_v52, %v693_v55 }
 0x11b   : > { %v709_v56 = vpack.c.bf16 %v692_v54, %v691_v53 }
 0x11d   : > { %1262 = vmatprep.mubr.msk.bf16.mxu1 %vm734_vm2, %v709_v56 }
 0x11e   : > { %1263 = vmatmul.mubr.msk.bf16.gmra.mxu1 %vm734_vm2, %v710_v57 }
 0x1a6   : > { %v1236_v11 = vpop.f32.mrf.mxu1 }
 0x1a7   : > { %v826_v59 = vadd.f32 %v1236_v11, %v1513_v58 }
 0x1a8   : > { %v817_v60 = vpop.f32.mrf.mxu1 }
 0x1a9   : > { %947 = vst.msk [vmem:[%s1518_s26 + $0x10] sm:$0xff] %vm944_vm3, %v826_v59  ;;  %v818_v61 = vadd.f32 %v1513_v58, %v817_v60 }
 0x1aa   : > { %v1237_v62 = vpop.f32.mrf.mxu1 }
 0x1ab   : > { %945 = vst.msk [vmem:[%s1518_s26] sm:$0xff] %vm944_vm3, %v818_v61  ;;  %v829_v63 = vadd.f32 %v1237_v62, %v1513_v58 }
 0x1ac   : > { %v820_v0 = vpop.f32.mrf.mxu1 }
 0x1ad   : > { %948 = vst.msk [vmem:[%s1518_s26 + $0x18] sm:$0xff] %vm944_vm3, %v829_v63  ;;  %v821_v1 = vadd.f32 %v1513_v58, %v820_v0 }
 0x1ae   : > { %v1240_v3 = vpop.f32.mrf.mxu1 }
 0x1af   : > { %946 = vst.msk [vmem:[%s1518_s26 + $0x8] sm:$0xff] %vm944_vm3, %v821_v1  ;;  %v842_v4 = vadd.f32 %v1240_v3, %v1513_v58 }
 0x1b0   : > { %v833_v5 = vpop.f32.mrf.mxu1 }
 0x1b1   : > { %951 = vst.msk [vmem:[%s1518_s26 + $0x30] sm:$0xff] %vm944_vm3, %v842_v4  ;;  %v834_v6 = vadd.f32 %v1513_v58, %v833_v5 }
 0x1b2   : > { %v1241_v7 = vpop.f32.mrf.mxu1 }
 0x1b3   : > { %949 = vst.msk [vmem:[%s1518_s26 + $0x20] sm:$0xff] %vm944_vm3, %v834_v6  ;;  %v845_v2 = vadd.f32 %v1241_v7, %v1513_v58 }
 0x1b4   : > { %v836_v8 = vpop.f32.mrf.mxu1 }
 0x1b5   : > { %952 = vst.msk [vmem:[%s1518_s26 + $0x38] sm:$0xff] %vm944_vm3, %v845_v2  ;;  %v837_v9 = vadd.f32 %v1513_v58, %v836_v8 }
 0x1b6   : > { %v1244_v10 = vpop.f32.mrf.mxu1 }
 0x1b7   : > { %950 = vst.msk [vmem:[%s1518_s26 + $0x28] sm:$0xff] %vm944_vm3, %v837_v9  ;;  %v858_v12 = vadd.f32 %v1244_v10, %v1513_v58 }
 0x1b8   : > { %v849_v13 = vpop.f32.mrf.mxu1 }
 0x1b9   : > { %955 = vst.msk [vmem:[%s1518_s26 + $0x50] sm:$0xff] %vm944_vm3, %v858_v12  ;;  %v850_v14 = vadd.f32 %v1513_v58, %v849_v13 }
 0x1ba   : > { %v1245_v15 = vpop.f32.mrf.mxu1 }
 0x1bb   : > { %953 = vst.msk [vmem:[%s1518_s26 + $0x40] sm:$0xff] %vm944_vm3, %v850_v14  ;;  %v861_v16 = vadd.f32 %v1245_v15, %v1513_v58 }
 0x1bc   : > { %v852_v17 = vpop.f32.mrf.mxu1 }
 0x1bd   : > { %956 = vst.msk [vmem:[%s1518_s26 + $0x58] sm:$0xff] %vm944_vm3, %v861_v16  ;;  %v853_v18 = vadd.f32 %v1513_v58, %v852_v17 }
 0x1be   : > { %v1248_v19 = vpop.f32.mrf.mxu1 }
 0x1bf   : > { %954 = vst.msk [vmem:[%s1518_s26 + $0x48] sm:$0xff] %vm944_vm3, %v853_v18  ;;  %v874_v20 = vadd.f32 %v1248_v19, %v1513_v58 }
 0x1c0   : > { %v865_v21 = vpop.f32.mrf.mxu1 }
 0x1c1   : > { %959 = vst.msk [vmem:[%s1518_s26 + $0x70] sm:$0xff] %vm944_vm3, %v874_v20  ;;  %v866_v22 = vadd.f32 %v1513_v58, %v865_v21 }
 0x1c2   : > { %v1249_v23 = vpop.f32.mrf.mxu1 }
 0x1c3   : > { %957 = vst.msk [vmem:[%s1518_s26 + $0x60] sm:$0xff] %vm944_vm3, %v866_v22  ;;  %v877_v24 = vadd.f32 %v1249_v23, %v1513_v58 }
 0x1c4   : > { %v868_v25 = vpop.f32.mrf.mxu1 }
 0x1c5   : > { %960 = vst.msk [vmem:[%s1518_s26 + $0x78] sm:$0xff] %vm944_vm3, %v877_v24  ;;  %v869_v26 = vadd.f32 %v1513_v58, %v868_v25 }
 0x1c6   : > { %v1252_v27 = vpop.f32.mrf.mxu1 }
 0x1c7   : > { %958 = vst.msk [vmem:[%s1518_s26 + $0x68] sm:$0xff] %vm944_vm3, %v869_v26  ;;  %v890_v28 = vadd.f32 %v1252_v27, %v1513_v58 }
 0x1c8   : > { %v881_v29 = vpop.f32.mrf.mxu1 }
 0x1c9   : > { %963 = vst.msk [vmem:[%s1518_s26 + $0x90] sm:$0xff] %vm944_vm3, %v890_v28  ;;  %v882_v30 = vadd.f32 %v1513_v58, %v881_v29 }
 0x1ca   : > { %v1253_v31 = vpop.f32.mrf.mxu1 }
 0x1cb   : > { %961 = vst.msk [vmem:[%s1518_s26 + $0x80] sm:$0xff] %vm944_vm3, %v882_v30  ;;  %v893_v32 = vadd.f32 %v1253_v31, %v1513_v58 }
 0x1cc   : > { %v884_v33 = vpop.f32.mrf.mxu1 }
 0x1cd   : > { %964 = vst.msk [vmem:[%s1518_s26 + $0x98] sm:$0xff] %vm944_vm3, %v893_v32  ;;  %v885_v34 = vadd.f32 %v1513_v58, %v884_v33 }
 0x1ce   : > { %v1256_v35 = vpop.f32.mrf.mxu1 }
 0x1cf   : > { %962 = vst.msk [vmem:[%s1518_s26 + $0x88] sm:$0xff] %vm944_vm3, %v885_v34  ;;  %v906_v36 = vadd.f32 %v1256_v35, %v1513_v58 }
 0x1d0   : > { %v897_v37 = vpop.f32.mrf.mxu1 }
 0x1d1   : > { %967 = vst.msk [vmem:[%s1518_s26 + $0xb0] sm:$0xff] %vm944_vm3, %v906_v36  ;;  %v898_v38 = vadd.f32 %v1513_v58, %v897_v37 }
 0x1d2   : > { %v1257_v39 = vpop.f32.mrf.mxu1 }
 0x1d3   : > { %965 = vst.msk [vmem:[%s1518_s26 + $0xa0] sm:$0xff] %vm944_vm3, %v898_v38  ;;  %v909_v40 = vadd.f32 %v1257_v39, %v1513_v58 }
 0x1d4   : > { %v900_v41 = vpop.f32.mrf.mxu1 }
 0x1d5   : > { %968 = vst.msk [vmem:[%s1518_s26 + $0xb8] sm:$0xff] %vm944_vm3, %v909_v40  ;;  %v901_v42 = vadd.f32 %v1513_v58, %v900_v41 }
 0x1d6   : > { %v1260_v43 = vpop.f32.mrf.mxu1 }
 0x1d7   : > { %966 = vst.msk [vmem:[%s1518_s26 + $0xa8] sm:$0xff] %vm944_vm3, %v901_v42  ;;  %v922_v44 = vadd.f32 %v1260_v43, %v1513_v58 }
 0x1d8   : > { %v913_v45 = vpop.f32.mrf.mxu1 }
 0x1d9   : > { %971 = vst.msk [vmem:[%s1518_s26 + $0xd0] sm:$0xff] %vm944_vm3, %v922_v44  ;;  %v914_v46 = vadd.f32 %v1513_v58, %v913_v45 }
 0x1da   : > { %v1261_v47 = vpop.f32.mrf.mxu1 }
 0x1db   : > { %969 = vst.msk [vmem:[%s1518_s26 + $0xc0] sm:$0xff] %vm944_vm3, %v914_v46  ;;  %v925_v48 = vadd.f32 %v1261_v47, %v1513_v58 }
 0x1dc   : > { %v916_v49 = vpop.f32.mrf.mxu1 }
 0x1dd   : > { %972 = vst.msk [vmem:[%s1518_s26 + $0xd8] sm:$0xff] %vm944_vm3, %v925_v48  ;;  %v917_v50 = vadd.f32 %v1513_v58, %v916_v49 }
 0x1de   : > { %v1264_v51 = vpop.f32.mrf.mxu1 }
 0x1df   : > { %970 = vst.msk [vmem:[%s1518_s26 + $0xc8] sm:$0xff] %vm944_vm3, %v917_v50  ;;  %v938_v52 = vadd.f32 %v1264_v51, %v1513_v58 }
 0x1e0   : > { %v929_v53 = vpop.f32.mrf.mxu1 }
 0x1e1   : > { %975 = vst.msk [vmem:[%s1518_s26 + $0xf0] sm:$0xff] %vm944_vm3, %v938_v52  ;;  %v930_v54 = vadd.f32 %v1513_v58, %v929_v53 }
 0x1e2   : > { %v1265_v55 = vpop.f32.mrf.mxu1 }
 0x1e3   : > { %973 = vst.msk [vmem:[%s1518_s26 + $0xe0] sm:$0xff] %vm944_vm3, %v930_v54  ;;  %v941_v56 = vadd.f32 %v1265_v55, %v1513_v58 }
 0x1e4   : > { %v932_v57 = vpop.f32.mrf.mxu1 }
 0x1e5   : > { %976 = vst.msk [vmem:[%s1518_s26 + $0xf8] sm:$0xff] %vm944_vm3, %v941_v56  ;;  %v933_v11 = vadd.f32 %v1513_v58, %v932_v57 }
 0x1e7   : > { %974 = vst.msk [vmem:[%s1518_s26 + $0xe8] sm:$0xff] %vm944_vm3, %v933_v11 }
 0x1e8 PF: > { %s17_s24 = sadd.s32 1, %s1283_s24  }
 0x1e9   : > { %p14_p4 = scmp.ge.s32.totalorder %s17_s24, 4  }
 0x1eb   :  { %16 = sbr.rel (!%p14_p4) target bundleno = 1 (0x1), region = 78 }

// kernel: autoencoder_forward.2
= control target key start
LH: loop header
LB: loop body
LE: loop exit
PB: predicated region body
PF: predicated region fallthrough
CT: control target
= control target key end

     0   :  { %s1724_s21 = smov 0   ;;  %s2695_s0 = inlined_call_operand.vmem [shape: f32[512,64], index: 0, kind: input, shape index: {}]   ;;  %s2696_s1 = inlined_call_operand.vmem [shape: bf16[64,32], index: 1, kind: input, shape index: {}]   ;;  %s2697_s2 = inlined_call_operand.vmem [shape: f32[1,32], index: 2, kind: input, shape index: {}]   ;;  %s2698_s3 = inlined_call_operand.vmem [shape: bf16[32,8], index: 3, kind: input, shape index: {}]   ;;  %s2699_s4 = inlined_call_operand.vmem [shape: f32[1,8], index: 4, kind: input, shape index: {}]   ;;  %s2700_s5 = inlined_call_operand.vmem [shape: bf16[512,8], index: 5, kind: output, shape index: {0}]   ;;  %s2701_s6 = inlined_call_operand.vmem [shape: f32[2,1,16], index: 6, kind: output, shape index: {1}]  }
   0x1 LB: > { %s1730_s22 = sadd.s32 4294967295, %s1686_s21   ;;  %p1437_p0 = scmp.ge.s32.totalorder %s1686_s21, 1  ;;  %s1686_s21 = sphi %s1724_s21, %s17_s21  }
   0x2   : > { %p216_p1 = scmp.lt.s32.totalorder %s1686_s21, 3 }
   0x4   : > { %p217_p2 = pnand %p1437_p0, %p216_p1 }
   0x6   : > { %220 = sbr.rel (%p217_p2) target bundleno = 718 (0x2ce), region = 40 }
   0xb   : > { %v1672_v0 = vld [vmem:[%s2696_s1 + $0x18] sm:$0xff]   ;;  %s1438_s25 = sshll.u32 %s1730_s22, 5  ;;  %v1673_v1 = vld [vmem:[%s2696_s1 + $0x10] sm:$0xff]   ;;  %v1674_v2 = vld [vmem:[%s2696_s1 + $0x8] sm:$0xff]   ;;  %vm352_vm0 = vcmask 523264   ;;  %vm633_vm1 = vcmask 261120  }
   0xc   : > { %p250_p3 = scmp.lt.s32.totalorder %s1438_s25, 63  ;;  %1587 = vmatprep.subr.bf16.mxu0 %v1672_v0  ;;  %v1675_v5 = vld [vmem:[%s2696_s1] sm:$0xff]   ;;  %v1676_v52 = vld [vmem:[%s2698_s3 + $0x8] sm:$0xff]   ;;  %s1514_s18 = sshll.u32 %s1730_s22, 8  ;;  %vm971_vm2 = vcmask 60416   ;;  %vm1107_vm6 = vcmask 64512  }
   0xd   : > { %1588 = vmatpush3.bf16.msra.mxu0 %v1672_v0  ;;  %1627 = vmatprep.subr.bf16.mxu1 %v1676_v52  ;;  %v1677_v53 = vld [vmem:[%s2698_s3] sm:$0xff]   ;;  %s1871_s24 = ssub.s32 512, %s1514_s18  ;;  %s1688_s29 = smov 8  }
   0xe   : > { %s2799_s25 = smov (!%p250_p3, %s1438_s25), 63  ;;  %1589 = vmatprep.subr.bf16.mxu0 %v1673_v1  ;;  %1628 = vmatpush3.bf16.msra.mxu1 %v1676_v52  ;;  %v1812_v56 = vld [vmem:[%s2697_s2] ss:$0 sm:$0xff]  ;;  %p1006_p4 = scmp.lt.s32.totalorder %s1871_s24, 256 }
   0xf   : > { %s1439_s30 = sshll.u32 %s2799_s25, 3  ;;  %1629 = vmatprep.subr.bf16.mxu1 %v1677_v53  ;;  %s1441_s23 = sshll.u32 %s2799_s25, 2 }
  0x10   : > { %s1750_s9 = scalar_lea.vmem %s2695_s0, %s1439_s30  ;;  %s1879_s28 = scalar_lea.vmem %s2700_s5, %s1441_s23 }
  0x11   : > { %1590 = vmatpush3.bf16.msra.mxu0 %v1673_v1  ;;  %v265_v3 = vld [vmem:[%s1750_s9] sm:$0xff]  ;;  %v266_v4 = vld [vmem:[%s1750_s9 + $0x8] sm:$0xff]  ;;  %v267_v7 = vld [vmem:[%s1750_s9 + $0x10] sm:$0xff]  ;;  %p261_p5 = scmp.lt.s32.totalorder %s1730_s22, 1 }
  0x12   : > { %1591 = vmatprep.subr.bf16.mxu0 %v1674_v2  ;;  %v297_v6 = vpack.c.bf16 %v266_v4, %v265_v3  ;;  %v268_v8 = vld [vmem:[%s1750_s9 + $0x18] sm:$0xff]  ;;  %v269_v9 = vld [vmem:[%s1750_s9 + $0x20] sm:$0xff]  ;;  %v270_v10 = vld [vmem:[%s1750_s9 + $0x28] sm:$0xff]  ;;  %1630 = vmatpush3.bf16.msra.mxu1 %v1677_v53 }
  0x13   : > { %v298_v11 = vpack.c.bf16 %v268_v8, %v267_v7  ;;  %v299_v12 = vpack.c.bf16 %v270_v10, %v269_v9  ;;  %v271_v13 = vld [vmem:[%s1750_s9 + $0x30] sm:$0xff]  ;;  %v272_v14 = vld [vmem:[%s1750_s9 + $0x38] sm:$0xff]  ;;  %v273_v15 = vld [vmem:[%s1750_s9 + $0x40] sm:$0xff]  ;;  %s2803_s22 = smov (!%p261_p5, %s1730_s22), 1 }
  0x14   : > { %1595 = vmatprep.mubr.msk.bf16.mxu0 %vm352_vm0, %v297_v6  ;;  %v274_v16 = vld [vmem:[%s1750_s9 + $0x48] sm:$0xff]  ;;  %v300_v17 = vpack.c.bf16 %v272_v14, %v271_v13  ;;  %v275_v19 = vld [vmem:[%s1750_s9 + $0x50] sm:$0xff]  ;;  %v276_v20 = vld [vmem:[%s1750_s9 + $0x58] sm:$0xff]  ;;  %s263_s8 = scalar_lea.vmem %s2701_s6, %s2803_s22 }
  0x15   : > { %1592 = vmatpush3.bf16.msra.mxu0 %v1674_v2  ;;  %v301_v18 = vpack.c.bf16 %v274_v16, %v273_v15  ;;  %v277_v21 = vld [vmem:[%s1750_s9 + $0x60] sm:$0xff]  ;;  %v278_v22 = vld [vmem:[%s1750_s9 + $0x68] sm:$0xff]  ;;  %v302_v23 = vpack.c.bf16 %v276_v20, %v275_v19  ;;  %v279_v25 = vld [vmem:[%s1750_s9 + $0x70] sm:$0xff] }
  0x16   : > { %1593 = vmatprep.subr.bf16.mxu0 %v1675_v5  ;;  %v303_v24 = vpack.c.bf16 %v278_v22, %v277_v21  ;;  %v280_v26 = vld [vmem:[%s1750_s9 + $0x78] sm:$0xff]  ;;  %v281_v27 = vld [vmem:[%s1750_s9 + $0x80] sm:$0xff]  ;;  %v282_v28 = vld [vmem:[%s1750_s9 + $0x88] sm:$0xff] }
  0x17   : > { %v304_v29 = vpack.c.bf16 %v280_v26, %v279_v25  ;;  %v305_v30 = vpack.c.bf16 %v282_v28, %v281_v27  ;;  %v283_v31 = vld [vmem:[%s1750_s9 + $0x90] sm:$0xff]  ;;  %v284_v32 = vld [vmem:[%s1750_s9 + $0x98] sm:$0xff]  ;;  %v285_v33 = vld [vmem:[%s1750_s9 + $0xa0] sm:$0xff] }
  0x18   : > { %v286_v34 = vld [vmem:[%s1750_s9 + $0xa8] sm:$0xff]  ;;  %v306_v35 = vpack.c.bf16 %v284_v32, %v283_v31  ;;  %v287_v37 = vld [vmem:[%s1750_s9 + $0xb0] sm:$0xff]  ;;  %v288_v38 = vld [vmem:[%s1750_s9 + $0xb8] sm:$0xff] }
  0x19   : > { %1594 = vmatpush3.bf16.msra.mxu0 %v1675_v5  ;;  %v307_v36 = vpack.c.bf16 %v286_v34, %v285_v33  ;;  %v289_v39 = vld [vmem:[%s1750_s9 + $0xc0] sm:$0xff]  ;;  %v290_v40 = vld [vmem:[%s1750_s9 + $0xc8] sm:$0xff]  ;;  %v308_v41 = vpack.c.bf16 %v288_v38, %v287_v37  ;;  %v291_v43 = vld [vmem:[%s1750_s9 + $0xd0] sm:$0xff] }
  0x1a   : > { %v309_v42 = vpack.c.bf16 %v290_v40, %v289_v39  ;;  %v292_v44 = vld [vmem:[%s1750_s9 + $0xd8] sm:$0xff]  ;;  %v293_v45 = vld [vmem:[%s1750_s9 + $0xe0] sm:$0xff]  ;;  %v294_v46 = vld [vmem:[%s1750_s9 + $0xe8] sm:$0xff] }
  0x1b   : > { %v310_v47 = vpack.c.bf16 %v292_v44, %v291_v43  ;;  %v311_v48 = vpack.c.bf16 %v294_v46, %v293_v45  ;;  %v295_v49 = vld [vmem:[%s1750_s9 + $0xf0] sm:$0xff]  ;;  %v296_v50 = vld [vmem:[%s1750_s9 + $0xf8] sm:$0xff] }
  0x1c   : > { %1596 = vmatmul.mubr.msk.bf16.vlgmr.msra.gmra.mxu0 %vm352_vm0, %v298_v11  ;;  %v312_v51 = vpack.c.bf16 %v296_v50, %v295_v49 }
  0x1d   : > { %1599 = vmatprep.mubr.msk.bf16.mxu0 %vm352_vm0, %v299_v12 }
  0x24   : > { %1600 = vmatmul.mubr.msk.bf16.gmra.mxu0 %vm352_vm0, %v300_v17 }
  0x25   : > { %1603 = vmatprep.mubr.msk.bf16.mxu0 %vm352_vm0, %v301_v18 }
  0x2c   : > { %1604 = vmatmul.mubr.msk.bf16.gmra.mxu0 %vm352_vm0, %v302_v23 }
  0x2d   : > { %1607 = vmatprep.mubr.msk.bf16.mxu0 %vm352_vm0, %v303_v24 }
  0x34   : > { %1608 = vmatmul.mubr.msk.bf16.gmra.mxu0 %vm352_vm0, %v304_v29 }
  0x35   : > { %1611 = vmatprep.mubr.msk.bf16.mxu0 %vm352_vm0, %v305_v30 }
  0x3c   : > { %1612 = vmatmul.mubr.msk.bf16.gmra.mxu0 %vm352_vm0, %v306_v35 }
  0x3d   : > { %1615 = vmatprep.mubr.msk.bf16.mxu0 %vm352_vm0, %v307_v36 }
  0x44   : > { %1616 = vmatmul.mubr.msk.bf16.gmra.mxu0 %vm352_vm0, %v308_v41 }
  0x45   : > { %1619 = vmatprep.mubr.msk.bf16.mxu0 %vm352_vm0, %v309_v42 }
  0x4c   : > { %1620 = vmatmul.mubr.msk.bf16.gmra.mxu0 %vm352_vm0, %v310_v47 }
  0x4d   : > { %1623 = vmatprep.mubr.msk.bf16.mxu0 %vm352_vm0, %v311_v48 }
  0x54   : > { %1624 = vmatmul.mubr.msk.bf16.gmra.mxu0 %vm352_vm0, %v312_v51 }
  0xdc   : > { %v1597_v54 = vpop.f32.mrf.mxu0 }
  0xdd   : > { %v444_v60 = vadd.f32 %v1597_v54, %v1812_v56 }
  0xde   : > { %v435_v55 = vpop.f32.mrf.mxu0 }
  0xdf   : > { %v436_v58 = vadd.f32 %v1812_v56, %v435_v55  ;;  %v564_v3 = vmax.f32 %v444_v60, 0.0 }
  0xe0   : > { %v1598_v57 = vpop.f32.mrf.mxu0 }
  0xe1   : > { %v447_v59 = vadd.f32 %v1598_v57, %v1812_v56  ;;  %v562_v1 = vmax.f32 %v436_v58, 0.0 }
  0xe2   : > { %v438_v61 = vpop.f32.mrf.mxu0 }
  0xe3   : > { %v439_v62 = vadd.f32 %v1812_v56, %v438_v61  ;;  %v565_v63 = vmax.f32 %v447_v59, 0.0 }
  0xe4   : > { %v1601_v0 = vpop.f32.mrf.mxu0 }
  0xe5   : > { %v563_v2 = vmax.f32 %v439_v62, 0.0  ;;  %v595_v6 = vpack.c.bf16 %v565_v63, %v564_v3  ;;  %v460_v10 = vadd.f32 %v1601_v0, %v1812_v56 }
  0xe6   : > { %v451_v4 = vpop.f32.mrf.mxu0 }
  0xe7   : > { %v594_v5 = vpack.c.bf16 %v563_v2, %v562_v1  ;;  %v452_v8 = vadd.f32 %v1812_v56, %v451_v4  ;;  %v568_v17 = vmax.f32 %v460_v10, 0.0 }
  0xe8   : > { %v1602_v7 = vpop.f32.mrf.mxu0 }
  0xe9   : > { %v463_v9 = vadd.f32 %v1602_v7, %v1812_v56  ;;  %1631 = vmatprep.mubr.msk.bf16.mxu1 %vm633_vm1, %v594_v5  ;;  %v566_v15 = vmax.f32 %v452_v8, 0.0 }
  0xea   : > { %v454_v11 = vpop.f32.mrf.mxu0  ;;  %1632 = vmatmul.mubr.msk.bf16.vlgmr.msra.gmra.mxu1 %vm633_vm1, %v595_v6 }
  0xeb   : > { %v455_v12 = vadd.f32 %v1812_v56, %v454_v11  ;;  %v569_v13 = vmax.f32 %v463_v9, 0.0 }
  0xec   : > { %v1605_v14 = vpop.f32.mrf.mxu0 }
  0xed   : > { %v567_v16 = vmax.f32 %v455_v12, 0.0  ;;  %v597_v20 = vpack.c.bf16 %v569_v13, %v568_v17  ;;  %v476_v24 = vadd.f32 %v1605_v14, %v1812_v56 }
  0xee   : > { %v467_v18 = vpop.f32.mrf.mxu0 }
  0xef   : > { %v596_v19 = vpack.c.bf16 %v567_v16, %v566_v15  ;;  %v468_v22 = vadd.f32 %v1812_v56, %v467_v18  ;;  %v572_v31 = vmax.f32 %v476_v24, 0.0 }
  0xf0   : > { %v1606_v21 = vpop.f32.mrf.mxu0 }
  0xf1   : > { %v479_v23 = vadd.f32 %v1606_v21, %v1812_v56  ;;  %1635 = vmatprep.mubr.msk.bf16.mxu1 %vm633_vm1, %v596_v19  ;;  %v570_v29 = vmax.f32 %v468_v22, 0.0 }
  0xf2   : > { %v470_v25 = vpop.f32.mrf.mxu0  ;;  %1636 = vmatmul.mubr.msk.bf16.gmra.mxu1 %vm633_vm1, %v597_v20 }
  0xf3   : > { %v471_v26 = vadd.f32 %v1812_v56, %v470_v25  ;;  %v573_v27 = vmax.f32 %v479_v23, 0.0 }
  0xf4   : > { %v1609_v28 = vpop.f32.mrf.mxu0 }
  0xf5   : > { %v571_v30 = vmax.f32 %v471_v26, 0.0  ;;  %v599_v34 = vpack.c.bf16 %v573_v27, %v572_v31  ;;  %v492_v38 = vadd.f32 %v1609_v28, %v1812_v56 }
  0xf6   : > { %v483_v32 = vpop.f32.mrf.mxu0 }
  0xf7   : > { %v598_v33 = vpack.c.bf16 %v571_v30, %v570_v29  ;;  %v484_v36 = vadd.f32 %v1812_v56, %v483_v32  ;;  %v576_v45 = vmax.f32 %v492_v38, 0.0 }
  0xf8   : > { %v1610_v35 = vpop.f32.mrf.mxu0 }
  0xf9   : > { %v495_v37 = vadd.f32 %v1610_v35, %v1812_v56  ;;  %1639 = vmatprep.mubr.msk.bf16.mxu1 %vm633_vm1, %v598_v33  ;;  %v574_v43 = vmax.f32 %v484_v36, 0.0 }
  0xfa   : > { %v486_v39 = vpop.f32.mrf.mxu0  ;;  %1640 = vmatmul.mubr.msk.bf16.gmra.mxu1 %vm633_vm1, %v599_v34 }
  0xfb   : > { %v487_v40 = vadd.f32 %v1812_v56, %v486_v39  ;;  %v577_v41 = vmax.f32 %v495_v37, 0.0 }
  0xfc   : > { %v1613_v42 = vpop.f32.mrf.mxu0 }
  0xfd   : > { %v575_v44 = vmax.f32 %v487_v40, 0.0  ;;  %v601_v48 = vpack.c.bf16 %v577_v41, %v576_v45  ;;  %v508_v52 = vadd.f32 %v1613_v42, %v1812_v56  ;;  %v1009_v40 = vlaneseq  ;;  %v1866_v41 = vld [vmem:[%s2699_s4] ss:$0 sm:$0xff] }
  0xfe   : > { %v499_v46 = vpop.f32.mrf.mxu0 }
  0xff   : > { %v600_v47 = vpack.c.bf16 %v575_v44, %v574_v43  ;;  %v500_v50 = vadd.f32 %v1812_v56, %v499_v46  ;;  %v580_v60 = vmax.f32 %v508_v52, 0.0  ;;  %v1868_v42 = vshrl.u32 %v1009_v40, 7 }
 0x100   : > { %v1614_v49 = vpop.f32.mrf.mxu0 }
 0x101   : > { %v511_v51 = vadd.f32 %v1614_v49, %v1812_v56  ;;  %1643 = vmatprep.mubr.msk.bf16.mxu1 %vm633_vm1, %v600_v47  ;;  %v578_v58 = vmax.f32 %v500_v50, 0.0  ;;  %v1882_v44 = vadd.s32 16, %v1868_v42  ;;  %v1885_v46 = vadd.s32 8, %v1868_v42 }
 0x102   : > { %v502_v53 = vpop.f32.mrf.mxu0  ;;  %1644 = vmatmul.mubr.msk.bf16.gmra.mxu1 %vm633_vm1, %v601_v48  ;;  %v1890_v48 = vstv %s1871_s24  ;;  %v2035_v40 = vadd.s32 88, %v1868_v42  ;;  %s2801_s24 = smov (!%p1006_p4, %s1871_s24), 256 }
 0x103   : > { %v503_v54 = vadd.f32 %v1812_v56, %v502_v53  ;;  %v581_v55 = vmax.f32 %v511_v51, 0.0  ;;  %vm2722_vm3 = vcmp.lt.s32.totalorder %v1868_v42, %v1890_v48  ;;  %v1898_v51 = vadd.s32 24, %v1868_v42  ;;  %s1008_s25 = scvt.s32.f32 %s2801_s24 }
 0x104   : > { %v1617_v57 = vpop.f32.mrf.mxu0  ;;  %vm2717_vm4 = vcmp.lt.s32.totalorder %v1882_v44, %v1890_v48  ;;  %vm2719_vm5 = vcmp.lt.s32.totalorder %v1885_v46, %v1890_v48  ;;  %2747 = vst [vmem:[#allocation9_spill] sm:$0xff] %v2035_v40  ;;  %vm2702_vm15 = vcmp.lt.s32.totalorder %v2035_v40, %v1890_v48  ;;  %v2353_v40 = vadd.s32 240, %v1868_v42 }
 0x105   : > { %v579_v59 = vmax.f32 %v503_v54, 0.0  ;;  %v603_v63 = vpack.c.bf16 %v581_v55, %v580_v60  ;;  %v524_v3 = vadd.f32 %v1617_v57, %v1812_v56  ;;  %v1912_v55 = vadd.s32 32, %v1868_v42 }
 0x106   : > { %v515_v61 = vpop.f32.mrf.mxu0  ;;  %vm2713_vm7 = vcmp.lt.s32.totalorder %v1898_v51, %v1890_v48  ;;  %2757 = vst [vmem:[#allocation19_spill] sm:$0xff] %v2353_v40 }
 0x107   : > { %v602_v62 = vpack.c.bf16 %v579_v59, %v578_v58  ;;  %v516_v1 = vadd.f32 %v1812_v56, %v515_v61  ;;  %v584_v10 = vmax.f32 %v524_v3, 0.0  ;;  %v1928_v61 = vadd.s32 48, %v1868_v42 }
 0x108   : > { %v1618_v0 = vpop.f32.mrf.mxu0  ;;  %vm2712_vm8 = vcmp.lt.s32.totalorder %v1912_v55, %v1890_v48 }
 0x109   : > { %v527_v2 = vadd.f32 %v1618_v0, %v1812_v56  ;;  %1647 = vmatprep.mubr.msk.bf16.mxu1 %vm633_vm1, %v602_v62  ;;  %v582_v8 = vmax.f32 %v516_v1, 0.0  ;;  %2740 = vst [vmem:[#allocation2_spill] sm:$0xff] %v1928_v61  ;;  %vm2710_vm9 = vcmp.lt.s32.totalorder %v1928_v61, %v1890_v48 }
 0x10a   : > { %v518_v4 = vpop.f32.mrf.mxu0  ;;  %1648 = vmatmul.mubr.msk.bf16.gmra.mxu1 %vm633_vm1, %v603_v63 }
 0x10b   : > { %v519_v5 = vadd.f32 %v1812_v56, %v518_v4  ;;  %v585_v6 = vmax.f32 %v527_v2, 0.0 }
 0x10c   : > { %v1621_v7 = vpop.f32.mrf.mxu0 }
 0x10d   : > { %v583_v9 = vmax.f32 %v519_v5, 0.0  ;;  %v605_v13 = vpack.c.bf16 %v585_v6, %v584_v10  ;;  %v540_v17 = vadd.f32 %v1621_v7, %v1812_v56  ;;  %v1950_v5 = vadd.s32 40, %v1868_v42 }
 0x10e   : > { %v531_v11 = vpop.f32.mrf.mxu0 }
 0x10f   : > { %v604_v12 = vpack.c.bf16 %v583_v9, %v582_v8  ;;  %v532_v15 = vadd.f32 %v1812_v56, %v531_v11  ;;  %v588_v24 = vmax.f32 %v540_v17, 0.0  ;;  %vm2711_vm10 = vcmp.lt.s32.totalorder %v1950_v5, %v1890_v48 }
 0x110   : > { %v1622_v14 = vpop.f32.mrf.mxu0 }
 0x111   : > { %v543_v16 = vadd.f32 %v1622_v14, %v1812_v56  ;;  %1651 = vmatprep.mubr.msk.bf16.mxu1 %vm633_vm1, %v604_v12  ;;  %v586_v22 = vmax.f32 %v532_v15, 0.0  ;;  %v1967_v12 = vadd.s32 56, %v1868_v42 }
 0x112   : > { %v534_v18 = vpop.f32.mrf.mxu0  ;;  %1652 = vmatmul.mubr.msk.bf16.gmra.mxu1 %vm633_vm1, %v605_v13 }
 0x113   : > { %v535_v19 = vadd.f32 %v1812_v56, %v534_v18  ;;  %v589_v20 = vmax.f32 %v543_v16, 0.0  ;;  %2741 = vst [vmem:[#allocation3_spill] sm:$0xff] %v1967_v12  ;;  %vm2709_vm11 = vcmp.lt.s32.totalorder %v1967_v12, %v1890_v48 }
 0x114   : > { %v1625_v21 = vpop.f32.mrf.mxu0 }
 0x115   : > { %v587_v23 = vmax.f32 %v535_v19, 0.0  ;;  %v607_v27 = vpack.c.bf16 %v589_v20, %v588_v24  ;;  %v556_v31 = vadd.f32 %v1625_v21, %v1812_v56  ;;  %v1984_v19 = vadd.s32 64, %v1868_v42 }
 0x116   : > { %v547_v25 = vpop.f32.mrf.mxu0 }
 0x117   : > { %v606_v26 = vpack.c.bf16 %v587_v23, %v586_v22  ;;  %v548_v29 = vadd.f32 %v1812_v56, %v547_v25  ;;  %v592_v37 = vmax.f32 %v556_v31, 0.0  ;;  %2742 = vst [vmem:[#allocation4_spill] sm:$0xff] %v1984_v19  ;;  %vm2708_vm12 = vcmp.lt.s32.totalorder %v1984_v19, %v1890_v48 }
 0x118   : > { %v1626_v28 = vpop.f32.mrf.mxu0 }
 0x119   : > { %v559_v30 = vadd.f32 %v1626_v28, %v1812_v56  ;;  %1655 = vmatprep.mubr.msk.bf16.mxu1 %vm633_vm1, %v606_v26  ;;  %v590_v35 = vmax.f32 %v548_v29, 0.0  ;;  %v2001_v26 = vadd.s32 80, %v1868_v42 }
 0x11a   : > { %v550_v32 = vpop.f32.mrf.mxu0  ;;  %1656 = vmatmul.mubr.msk.bf16.gmra.mxu1 %vm633_vm1, %v607_v27 }
 0x11b   : > { %v551_v33 = vadd.f32 %v1812_v56, %v550_v32  ;;  %v593_v34 = vmax.f32 %v559_v30, 0.0  ;;  %2743 = vst [vmem:[#allocation5_spill] sm:$0xff] %v2001_v26  ;;  %vm2705_vm13 = vcmp.lt.s32.totalorder %v2001_v26, %v1890_v48 }
 0x11d   : > { %v591_v36 = vmax.f32 %v551_v33, 0.0  ;;  %v609_v39 = vpack.c.bf16 %v593_v34, %v592_v37  ;;  %v2018_v33 = vadd.s32 72, %v1868_v42 }
 0x11f   : > { %v608_v38 = vpack.c.bf16 %v591_v36, %v590_v35  ;;  %2745 = vst [vmem:[#allocation7_spill] sm:$0xff] %v2018_v33  ;;  %vm2707_vm14 = vcmp.lt.s32.totalorder %v2018_v33, %v1890_v48 }
 0x121   : > { %1659 = vmatprep.mubr.msk.bf16.mxu1 %vm633_vm1, %v608_v38 }
 0x122   : > { %1660 = vmatmul.mubr.msk.bf16.gmra.mxu1 %vm633_vm1, %v609_v39 }
 0x1aa   : > { %v1633_v56 = vpop.f32.mrf.mxu1 }
 0x1ab   : > { %v1874_v43 = vadd.f32 %v1633_v56, %v1866_v41 }
 0x1ac   : > { %v716_v45 = vpop.f32.mrf.mxu1 }
 0x1ad   : > { %v1519_v47 = vpack.c.bf16 %v1874_v43, %v1874_v43  ;;  %v1893_v49 = vadd.f32 %v1866_v41, %v716_v45  ;;  %v1077_v62 = vsel %vm2717_vm4, %v1874_v43, 0.0 }
 0x1ae   : > { %v1634_v50 = vpop.f32.mrf.mxu1  ;;  %v1111_v10 = vsel %vm1107_vm6, %v1077_v62, 0.0 }
 0x1af   : > { %974 = vst.msk [vmem:[%s1879_s28 + $0x8] sm:$0xf] %vm971_vm2, %v1519_v47  ;;  %v1517_v52 = vpack.c.bf16 %v1893_v49, %v1893_v49  ;;  %v1905_v53 = vadd.f32 %v1634_v50, %v1866_v41  ;;  %v1075_v57 = vsel %vm2722_vm3, %v1893_v49, 0.0 }
 0x1b0   : > { %v719_v54 = vpop.f32.mrf.mxu1  ;;  %v1108_v2 = vsel %vm1107_vm6, %v1075_v57, 0.0  ;;  %v2052_v57 = vadd.s32 96, %v1868_v42 }
 0x1b1   : > { %972 = vst.msk [vmem:[%s1879_s28] sm:$0xf] %vm971_vm2, %v1517_v52  ;;  %v1520_v58 = vpack.c.bf16 %v1905_v53, %v1905_v53  ;;  %v1923_v59 = vadd.f32 %v1866_v41, %v719_v54  ;;  %v1078_v6 = vsel %vm2713_vm7, %v1905_v53, 0.0 }
 0x1b2   : > { %v1637_v60 = vpop.f32.mrf.mxu1  ;;  %v1113_v17 = vsel %vm1107_vm6, %v1078_v6, 0.0  ;;  %2749 = vst [vmem:[#allocation11_spill] sm:$0xff] %v2052_v57  ;;  %vm2703_vm0 = vcmp.lt.s32.totalorder %v2052_v57, %v1890_v48 }
 0x1b3   : > { %975 = vst.msk [vmem:[%s1879_s28 + $0xc] sm:$0xf] %vm971_vm2, %v1520_v58  ;;  %v1518_v63 = vpack.c.bf16 %v1923_v59, %v1923_v59  ;;  %v1076_v0 = vsel %vm2719_vm5, %v1923_v59, 0.0  ;;  %v1943_v1 = vadd.f32 %v1637_v60, %v1866_v41 }
 0x1b4   : > { %v1109_v3 = vsel %vm1107_vm6, %v1076_v0, 0.0  ;;  %v732_v4 = vpop.f32.mrf.mxu1 }
 0x1b5   : > { %973 = vst.msk [vmem:[%s1879_s28 + $0x4] sm:$0xf] %vm971_vm2, %v1518_v63  ;;  %v1110_v7 = vadd.f32 %v1109_v3, %v1108_v2  ;;  %v1523_v8 = vpack.c.bf16 %v1943_v1, %v1943_v1  ;;  %v1961_v9 = vadd.f32 %v1866_v41, %v732_v4  ;;  %v1081_v23 = vsel %vm2710_vm9, %v1943_v1, 0.0 }
 0x1b6   : > { %v1638_v11 = vpop.f32.mrf.mxu1  ;;  %v1119_v38 = vsel %vm1107_vm6, %v1081_v23, 0.0  ;;  %v2069_v3 = vadd.s32 112, %v1868_v42  ;;  %v2103_v23 = vadd.s32 120, %v1868_v42 }
 0x1b7   : > { %v1112_v13 = vadd.f32 %v1111_v10, %v1110_v7  ;;  %978 = vst.msk [vmem:[%s1879_s28 + $0x18] sm:$0xf] %vm971_vm2, %v1523_v8  ;;  %v1521_v14 = vpack.c.bf16 %v1961_v9, %v1961_v9  ;;  %v1079_v15 = vsel %vm2712_vm8, %v1961_v9, 0.0  ;;  %v1978_v16 = vadd.f32 %v1638_v11, %v1866_v41 }
 0x1b8   : > { %v735_v18 = vpop.f32.mrf.mxu1  ;;  %v1115_v24 = vsel %vm1107_vm6, %v1079_v15, 0.0  ;;  %2751 = vst [vmem:[#allocation13_spill] sm:$0xff] %v2069_v3  ;;  %vm2704_vm1 = vcmp.lt.s32.totalorder %v2069_v3, %v1890_v48  ;;  %2754 = vst [vmem:[#allocation16_spill] sm:$0xff] %v2103_v23  ;;  %v2307_v3 = vadd.s32 216, %v1868_v42 }
 0x1b9   : > { %976 = vst.msk [vmem:[%s1879_s28 + $0x10] sm:$0xf] %vm971_vm2, %v1521_v14  ;;  %v1114_v20 = vadd.f32 %v1113_v17, %v1112_v13  ;;  %v1524_v21 = vpack.c.bf16 %v1978_v16, %v1978_v16  ;;  %v1991_v22 = vadd.f32 %v1866_v41, %v735_v18  ;;  %v1082_v34 = vsel %vm2709_vm11, %v1978_v16, 0.0 }
 0x1ba   : > { %v1641_v25 = vpop.f32.mrf.mxu1  ;;  %v1121_v52 = vsel %vm1107_vm6, %v1082_v34, 0.0  ;;  %v2086_v13 = vadd.s32 104, %v1868_v42  ;;  %vm2728_vm5 = vcmp.lt.s32.totalorder %v2307_v3, %v1890_v48 }
 0x1bb   : > { %v1116_v27 = vadd.f32 %v1115_v24, %v1114_v20  ;;  %979 = vst.msk [vmem:[%s1879_s28 + $0x1c] sm:$0xf] %vm971_vm2, %v1524_v21  ;;  %v1522_v28 = vpack.c.bf16 %v1991_v22, %v1991_v22  ;;  %v1080_v29 = vsel %vm2711_vm10, %v1991_v22, 0.0  ;;  %v2012_v30 = vadd.f32 %v1641_v25, %v1866_v41 }
 0x1bc   : > { %v1117_v31 = vsel %vm1107_vm6, %v1080_v29, 0.0  ;;  %v748_v32 = vpop.f32.mrf.mxu1 }
 0x1bd   : > { %2744 = vst [vmem:[#allocation6_spill] sm:$0xff] %v2012_v30  ;;  %977 = vst.msk [vmem:[%s1879_s28 + $0x14] sm:$0xf] %vm971_vm2, %v1522_v28  ;;  %v1118_v35 = vadd.f32 %v1117_v31, %v1116_v27  ;;  %v1527_v36 = vpack.c.bf16 %v2012_v30, %v2012_v30  ;;  %v2029_v37 = vadd.f32 %v1866_v41, %v748_v32  ;;  %v1085_v63 = vsel %vm2705_vm13, %v2012_v30, 0.0 }
 0x1be   : > { %v1642_v39 = vpop.f32.mrf.mxu1  ;;  %v1127_v20 = vsel %vm1107_vm6, %v1085_v63, 0.0  ;;  %v2120_v32 = vadd.s32 128, %v1868_v42 }
 0x1bf   : > { %2746 = vst [vmem:[#allocation8_spill] sm:$0xff] %v2029_v37  ;;  %v1120_v56 = vadd.f32 %v1119_v38, %v1118_v35  ;;  %982 = vst.msk [vmem:[%s1879_s28 + $0x28] sm:$0xf] %vm971_vm2, %v1527_v36  ;;  %v1525_v45 = vpack.c.bf16 %v2029_v37, %v2029_v37  ;;  %v1083_v47 = vsel %vm2708_vm12, %v2029_v37, 0.0  ;;  %v2046_v50 = vadd.f32 %v1642_v39, %v1866_v41 }
 0x1c0   : > { %v751_v54 = vpop.f32.mrf.mxu1  ;;  %v1123_v0 = vsel %vm1107_vm6, %v1083_v47, 0.0 }
 0x1c1   : > { %2748 = vst [vmem:[#allocation10_spill] sm:$0xff] %v2046_v50  ;;  %980 = vst.msk [vmem:[%s1879_s28 + $0x20] sm:$0xf] %vm971_vm2, %v1525_v45  ;;  %v1122_v58 = vadd.f32 %v1121_v52, %v1120_v56  ;;  %v1528_v60 = vpack.c.bf16 %v2046_v50, %v2046_v50  ;;  %v2059_v62 = vadd.f32 %v1866_v41, %v751_v54  ;;  %v1086_v14 = vsel %vm2702_vm15, %v2046_v50, 0.0 }
 0x1c2   : > { %v1645_v2 = vpop.f32.mrf.mxu1  ;;  %v1129_v29 = vsel %vm1107_vm6, %v1086_v14, 0.0  ;;  %vm1056_vm15 = vcmp.lt.s32.totalorder %v2086_v13, %v1890_v48  ;;  %v2137_v45 = vadd.s32 144, %v1868_v42  ;;  %v2171_v14 = vadd.s32 152, %v1868_v42 }
 0x1c3   : > { %2750 = vst [vmem:[#allocation12_spill] sm:$0xff] %v2059_v62  ;;  %v1124_v4 = vadd.f32 %v1123_v0, %v1122_v58  ;;  %983 = vst.msk [vmem:[%s1879_s28 + $0x2c] sm:$0xf] %vm971_vm2, %v1528_v60  ;;  %v1526_v6 = vpack.c.bf16 %v2059_v62, %v2059_v62  ;;  %v1084_v7 = vsel %vm2707_vm14, %v2059_v62, 0.0  ;;  %v2080_v8 = vadd.f32 %v1645_v2, %v1866_v41 }
 0x1c4   : > { %v1125_v10 = vsel %vm1107_vm6, %v1084_v7, 0.0  ;;  %v764_v11 = vpop.f32.mrf.mxu1  ;;  %v2154_v0 = vadd.s32 136, %v1868_v42  ;;  %vm1061_vm13 = vcmp.lt.s32.totalorder %v2137_v45, %v1890_v48  ;;  %vm1062_vm14 = vcmp.lt.s32.totalorder %v2171_v14, %v1890_v48 }
 0x1c5   : > { %2752 = vst [vmem:[#allocation14_spill] sm:$0xff] %v2080_v8  ;;  %981 = vst.msk [vmem:[%s1879_s28 + $0x24] sm:$0xf] %vm971_vm2, %v1526_v6  ;;  %v1126_v15 = vadd.f32 %v1125_v10, %v1124_v4  ;;  %v1531_v17 = vpack.c.bf16 %v2080_v8, %v2080_v8  ;;  %v2097_v18 = vadd.f32 %v1866_v41, %v764_v11  ;;  %v1089_v38 = vsel %vm2704_vm1, %v2080_v8, 0.0 }
 0x1c6   : > { %v1646_v21 = vpop.f32.mrf.mxu1  ;;  %vm1059_vm1 = vcmp.lt.s32.totalorder %v2120_v32, %v1890_v48  ;;  %v1135_v10 = vsel %vm1107_vm6, %v1089_v38, 0.0  ;;  %v2374_v50 = vadd.s32 248, %v1868_v42 }
 0x1c7   : > { %2753 = vst [vmem:[#allocation15_spill] sm:$0xff] %v2097_v18  ;;  %v1128_v24 = vadd.f32 %v1127_v20, %v1126_v15  ;;  %986 = vst.msk [vmem:[%s1879_s28 + $0x38] sm:$0xf] %vm971_vm2, %v1531_v17  ;;  %v1529_v25 = vpack.c.bf16 %v2097_v18, %v2097_v18  ;;  %v1087_v27 = vsel %vm2703_vm0, %v2097_v18, 0.0  ;;  %v2114_v28 = vadd.f32 %v1646_v21, %v1866_v41 }
 0x1c8   : > { %v767_v31 = vpop.f32.mrf.mxu1  ;;  %v1131_v39 = vsel %vm1107_vm6, %v1087_v27, 0.0  ;;  %vm2706_vm0 = vcmp.lt.s32.totalorder %v2103_v23, %v1890_v48  ;;  %v2188_v27 = vadd.s32 160, %v1868_v42  ;;  %2758 = vst [vmem:[#allocation20_spill] sm:$0xff] %v2374_v50 }
 0x1c9   : > { %2755 = vst [vmem:[#allocation17_spill] sm:$0xff] %v2114_v28  ;;  %984 = vst.msk [vmem:[%s1879_s28 + $0x30] sm:$0xf] %vm971_vm2, %v1529_v25  ;;  %v1130_v34 = vadd.f32 %v1129_v29, %v1128_v24  ;;  %v1532_v35 = vpack.c.bf16 %v2114_v28, %v2114_v28  ;;  %v2127_v36 = vadd.f32 %v1866_v41, %v767_v31  ;;  %v1090_v2 = vsel %vm2706_vm0, %v2114_v28, 0.0 }
 0x1ca   : > { %v1649_v56 = vpop.f32.mrf.mxu1  ;;  %v1137_v24 = vsel %vm1107_vm6, %v1090_v2, 0.0  ;;  %vm1060_vm0 = vcmp.lt.s32.totalorder %v2154_v0, %v1890_v48  ;;  %vm1063_vm12 = vcmp.lt.s32.totalorder %v2188_v27, %v1890_v48 }
 0x1cb   : > { %v1132_v47 = vadd.f32 %v1131_v39, %v1130_v34  ;;  %987 = vst.msk [vmem:[%s1879_s28 + $0x3c] sm:$0xf] %vm971_vm2, %v1532_v35  ;;  %v1530_v52 = vpack.c.bf16 %v2127_v36, %v2127_v36  ;;  %v1088_v54 = vsel %vm1056_vm15, %v2127_v36, 0.0  ;;  %v2148_v58 = vadd.f32 %v1649_v56, %v1866_v41 }
 0x1cc   : > { %v1133_v60 = vsel %vm1107_vm6, %v1088_v54, 0.0  ;;  %v780_v63 = vpop.f32.mrf.mxu1  ;;  %v2205_v56 = vadd.s32 176, %v1868_v42 }
 0x1cd   : > { %985 = vst.msk [vmem:[%s1879_s28 + $0x34] sm:$0xf] %vm971_vm2, %v1530_v52  ;;  %v1134_v4 = vadd.f32 %v1133_v60, %v1132_v47  ;;  %v1535_v6 = vpack.c.bf16 %v2148_v58, %v2148_v58  ;;  %v2165_v7 = vadd.f32 %v1866_v41, %v780_v63  ;;  %v1093_v35 = vsel %vm1061_vm13, %v2148_v58, 0.0 }
 0x1ce   : > { %v1650_v11 = vpop.f32.mrf.mxu1  ;;  %vm1065_vm11 = vcmp.lt.s32.totalorder %v2205_v56, %v1890_v48 }
 0x1cf   : > { %v1136_v15 = vadd.f32 %v1135_v10, %v1134_v4  ;;  %990 = vst.msk [vmem:[%s1879_s28 + $0x48] sm:$0xf] %vm971_vm2, %v1535_v6  ;;  %v1533_v17 = vpack.c.bf16 %v2165_v7, %v2165_v7  ;;  %v1091_v20 = vsel %vm1059_vm1, %v2165_v7, 0.0  ;;  %v2182_v21 = vadd.f32 %v1650_v11, %v1866_v41 }
 0x1d0   : > { %v783_v25 = vpop.f32.mrf.mxu1  ;;  %v1139_v38 = vsel %vm1107_vm6, %v1091_v20, 0.0  ;;  %v2222_v4 = vadd.s32 168, %v1868_v42 }
 0x1d1   : > { %988 = vst.msk [vmem:[%s1879_s28 + $0x40] sm:$0xf] %vm971_vm2, %v1533_v17  ;;  %v1138_v29 = vadd.f32 %v1137_v24, %v1136_v15  ;;  %v1536_v31 = vpack.c.bf16 %v2182_v21, %v2182_v21  ;;  %v2195_v34 = vadd.f32 %v1866_v41, %v783_v25  ;;  %v1094_v6 = vsel %vm1062_vm14, %v2182_v21, 0.0 }
 0x1d2   : > { %v1653_v39 = vpop.f32.mrf.mxu1  ;;  %v1143_v17 = vsel %vm1107_vm6, %v1093_v35, 0.0  ;;  %v2239_v24 = vadd.s32 184, %v1868_v42  ;;  %vm1064_vm9 = vcmp.lt.s32.totalorder %v2222_v4, %v1890_v48 }
 0x1d3   : > { %v1140_v47 = vadd.f32 %v1139_v38, %v1138_v29  ;;  %991 = vst.msk [vmem:[%s1879_s28 + $0x4c] sm:$0xf] %vm971_vm2, %v1536_v31  ;;  %v1534_v52 = vpack.c.bf16 %v2195_v34, %v2195_v34  ;;  %v1092_v54 = vsel %vm1060_vm0, %v2195_v34, 0.0  ;;  %v2216_v60 = vadd.f32 %v1653_v39, %v1866_v41 }
 0x1d4   : > { %v1141_v63 = vsel %vm1107_vm6, %v1092_v54, 0.0  ;;  %v796_v2 = vpop.f32.mrf.mxu1  ;;  %v1145_v38 = vsel %vm1107_vm6, %v1094_v6, 0.0  ;;  %vm1066_vm10 = vcmp.lt.s32.totalorder %v2239_v24, %v1890_v48 }
 0x1d5   : > { %989 = vst.msk [vmem:[%s1879_s28 + $0x44] sm:$0xf] %vm971_vm2, %v1534_v52  ;;  %v1142_v10 = vadd.f32 %v1141_v63, %v1140_v47  ;;  %v1539_v11 = vpack.c.bf16 %v2216_v60, %v2216_v60  ;;  %v2233_v15 = vadd.f32 %v1866_v41, %v796_v2  ;;  %v2256_v47 = vadd.s32 192, %v1868_v42 }
 0x1d6   : > { %v1654_v20 = vpop.f32.mrf.mxu1  ;;  %v1097_v2 = vsel %vm1065_vm11, %v2216_v60, 0.0 }
 0x1d7   : > { %v1144_v25 = vadd.f32 %v1143_v17, %v1142_v10  ;;  %994 = vst.msk [vmem:[%s1879_s28 + $0x58] sm:$0xf] %vm971_vm2, %v1539_v11  ;;  %v1537_v29 = vpack.c.bf16 %v2233_v15, %v2233_v15  ;;  %v1095_v31 = vsel %vm1063_vm12, %v2233_v15, 0.0  ;;  %v2250_v35 = vadd.f32 %v1654_v20, %v1866_v41 }
 0x1d8   : > { %v799_v39 = vpop.f32.mrf.mxu1  ;;  %v1147_v6 = vsel %vm1107_vm6, %v1095_v31, 0.0  ;;  %v2273_v11 = vadd.s32 208, %v1868_v42  ;;  %vm1067_vm8 = vcmp.lt.s32.totalorder %v2256_v47, %v1890_v48 }
 0x1d9   : > { %992 = vst.msk [vmem:[%s1879_s28 + $0x50] sm:$0xf] %vm971_vm2, %v1537_v29  ;;  %v1146_v52 = vadd.f32 %v1145_v38, %v1144_v25  ;;  %v1540_v54 = vpack.c.bf16 %v2250_v35, %v2250_v35  ;;  %v2263_v63 = vadd.f32 %v1866_v41, %v799_v39  ;;  %v2290_v39 = vadd.s32 200, %v1868_v42 }
 0x1da   : > { %v1657_v10 = vpop.f32.mrf.mxu1  ;;  %vm2729_vm7 = vcmp.lt.s32.totalorder %v2273_v11, %v1890_v48 }
 0x1db   : > { %v1148_v17 = vadd.f32 %v1147_v6, %v1146_v52  ;;  %995 = vst.msk [vmem:[%s1879_s28 + $0x5c] sm:$0xf] %vm971_vm2, %v1540_v54  ;;  %v1538_v20 = vpack.c.bf16 %v2263_v63, %v2263_v63  ;;  %v1096_v25 = vsel %vm1064_vm9, %v2263_v63, 0.0  ;;  %v2284_v29 = vadd.f32 %v1657_v10, %v1866_v41 }
 0x1dc   : > { %v1149_v31 = vsel %vm1107_vm6, %v1096_v25, 0.0  ;;  %v812_v38 = vpop.f32.mrf.mxu1  ;;  %v1098_v52 = vsel %vm1066_vm10, %v2250_v35, 0.0  ;;  %v1151_v25 = vsel %vm1107_vm6, %v1097_v2, 0.0  ;;  %vm1068_vm4 = vcmp.lt.s32.totalorder %v2290_v39, %v1890_v48 }
 0x1dd   : > { %993 = vst.msk [vmem:[%s1879_s28 + $0x54] sm:$0xf] %vm971_vm2, %v1538_v20  ;;  %v1150_v54 = vadd.f32 %v1149_v31, %v1148_v17  ;;  %v1543_v6 = vpack.c.bf16 %v2284_v29, %v2284_v29  ;;  %v2301_v10 = vadd.f32 %v1866_v41, %v812_v38  ;;  %v1153_v31 = vsel %vm1107_vm6, %v1098_v52, 0.0 }
 0x1de   : > { %v1658_v23 = vpop.f32.mrf.mxu1 }
 0x1df   : > { %v1152_v28 = vadd.f32 %v1151_v25, %v1150_v54  ;;  %998 = vst.msk [vmem:[%s1879_s28 + $0x68] sm:$0xf] %vm971_vm2, %v1543_v6  ;;  %v1541_v17 = vpack.c.bf16 %v2301_v10, %v2301_v10  ;;  %v1099_v20 = vsel %vm1067_vm8, %v2301_v10, 0.0  ;;  %v2318_v2 = vadd.f32 %v1658_v23, %v1866_v41 }
 0x1e0   : > { %v815_v38 = vpop.f32.mrf.mxu1  ;;  %v2324_v54 = vadd.s32 224, %v1868_v42  ;;  %v1101_v23 = vsel %vm2729_vm7, %v2284_v29, 0.0  ;;  %v1155_v52 = vsel %vm1107_vm6, %v1099_v20, 0.0 }
 0x1e1   : > { %996 = vst.msk [vmem:[%s1879_s28 + $0x60] sm:$0xf] %vm971_vm2, %v1541_v17  ;;  %v1154_v6 = vadd.f32 %v1153_v31, %v1152_v28  ;;  %v1544_v25 = vpack.c.bf16 %v2318_v2, %v2318_v2  ;;  %v2331_v57 = vadd.f32 %v1866_v41, %v815_v38  ;;  %v1159_v18 = vsel %vm1107_vm6, %v1101_v23, 0.0 }
 0x1e2   : > { %v1661_v17 = vpop.f32.mrf.mxu1  ;;  %vm2730_vm3 = vcmp.lt.s32.totalorder %v2324_v54, %v1890_v48 }
 0x1e3   : > { %v1156_v28 = vadd.f32 %v1155_v52, %v1154_v6  ;;  %999 = vst.msk [vmem:[%s1879_s28 + $0x6c] sm:$0xf] %vm971_vm2, %v1544_v25  ;;  %v1542_v31 = vpack.c.bf16 %v2331_v57, %v2331_v57  ;;  %v1100_v38 = vsel %vm1068_vm4, %v2331_v57, 0.0  ;;  %v2349_v8 = vadd.f32 %v1661_v17, %v1866_v41 }
 0x1e4   : > { %v1157_v20 = vsel %vm1107_vm6, %v1100_v38, 0.0  ;;  %v828_v6 = vpop.f32.mrf.mxu1  ;;  %v2359_v25 = vadd.s32 232, %v1868_v42  ;;  %v1102_v52 = vsel %vm2728_vm5, %v2318_v2, 0.0  ;;  %vm1073_vm5 = vcmp.lt.s32.totalorder %v2353_v40, %v1890_v48 }
 0x1e5   : > { %2756 = vst [vmem:[#allocation18_spill] sm:$0xff] %v2349_v8  ;;  %997 = vst.msk [vmem:[%s1879_s28 + $0x64] sm:$0xf] %vm971_vm2, %v1542_v31  ;;  %v1158_v17 = vadd.f32 %v1157_v20, %v1156_v28  ;;  %v1547_v38 = vpack.c.bf16 %v2349_v8, %v2349_v8  ;;  %v2370_v26 = vadd.f32 %v1866_v41, %v828_v6  ;;  %v1161_v23 = vsel %vm1107_vm6, %v1102_v52, 0.0 }
 0x1e6   : > { %v1662_v33 = vpop.f32.mrf.mxu1  ;;  %vm1072_vm7 = vcmp.lt.s32.totalorder %v2359_v25, %v1890_v48 }
 0x1e7   : > { %v1160_v19 = vadd.f32 %v1159_v18, %v1158_v17  ;;  %1002 = vst.msk [vmem:[%s1879_s28 + $0x78] sm:$0xf] %vm971_vm2, %v1547_v38  ;;  %v1545_v31 = vpack.c.bf16 %v2370_v26, %v2370_v26  ;;  %v1103_v28 = vsel %vm2730_vm3, %v2370_v26, 0.0  ;;  %v2385_v20 = vadd.f32 %v1662_v33, %v1866_v41 }
 0x1e8   : > { %v831_v18 = vpop.f32.mrf.mxu1  ;;  %v1163_v52 = vsel %vm1107_vm6, %v1103_v28, 0.0  ;;  %vm1074_vm3 = vcmp.lt.s32.totalorder %v2374_v50, %v1890_v48  ;;  %v1105_v38 = vsel %vm1073_vm5, %v2349_v8, 0.0 }
 0x1e9   : > { %2759 = vst [vmem:[#allocation21_spill] sm:$0xff] %v2385_v20  ;;  %1000 = vst.msk [vmem:[%s1879_s28 + $0x70] sm:$0xf] %vm971_vm2, %v1545_v31  ;;  %v1162_v6 = vadd.f32 %v1161_v23, %v1160_v19  ;;  %v1548_v17 = vpack.c.bf16 %v2385_v20, %v2385_v20  ;;  %v832_v33 = vadd.f32 %v1866_v41, %v831_v18  ;;  %v1106_v28 = vsel %vm1074_vm3, %v2385_v20, 0.0 }
 0x1ea   : > { %v1167_v18 = vsel %vm1107_vm6, %v1105_v38, 0.0 }
 0x1eb   : > { %v1164_v30 = vadd.f32 %v1163_v52, %v1162_v6  ;;  %1003 = vst.msk [vmem:[%s1879_s28 + $0x7c] sm:$0xf] %vm971_vm2, %v1548_v17  ;;  %v1546_v31 = vpack.c.bf16 %v832_v33, %v832_v33  ;;  %v1104_v19 = vsel %vm1072_vm7, %v832_v33, 0.0  ;;  %v1169_v17 = vsel %vm1107_vm6, %v1106_v28, 0.0 }
 0x1ec   : > { %v1165_v41 = vsel %vm1107_vm6, %v1104_v19, 0.0  ;;  %v1177_v52 = vstv %s1008_s25 }
 0x1ed   : > { %1001 = vst.msk [vmem:[%s1879_s28 + $0x74] sm:$0xf] %vm971_vm2, %v1546_v31  ;;  %v1166_v23 = vadd.f32 %v1165_v41, %v1164_v30  ;;  %1678 = vrcp.f32 %v1177_v52  ;;  %vm2760_vm2 = vcmp.lt.s32.totalorder %v2273_v11, %v1890_v48 }
 0x1ef   : > { %v1168_v6 = vadd.f32 %v1167_v18, %v1166_v23  ;;  %v2769_v18 = vld [vmem:[#allocation8_spill] sm:$0xff] }
 0x1f1   : > { %v1170_v40 = vadd.f32 %v1169_v17, %v1168_v6  ;;  %v2770_v6 = vld [vmem:[#allocation2_spill] sm:$0xff] }
 0x1f3   : > { %v1171_v8 = vrot.slane %v1170_v40, 4 }
 0x1f5   : > { %v1172_v12 = vadd.f32 %v1171_v8, %v1170_v40 }
 0x1f7   : > { %v1173_v62 = vrot.slane %v1172_v12, 2 }
 0x1f9   : > { %v1174_v19 = vadd.f32 %v1173_v62, %v1172_v12 }
 0x1fa   : > { %v1679_v50 = vpop.eup %1678 }
 0x1fb   : > { %v1175_v61 = vrot.slane %v1174_v19, 1 }
 0x1fd   : > { %v2421_v37 = vadd.f32 %v1175_v61, %v1174_v19 }
 0x1ff   : > { %v2424_v20 = vmul.f32 %v1679_v50, %v2421_v37 }
 0x201   : > { %v1193_v30 = vsub.f32 %v2127_v36, %v2424_v20  ;;  %v1180_v38 = vsub.f32 %v1893_v49, %v2424_v20  ;;  %v1196_v31 = vsub.f32 %v2165_v7, %v2424_v20  ;;  %v1197_v40 = vsub.f32 %v2195_v34, %v2424_v20 }
 0x202   : > { %v1198_v61 = vsub.f32 %v2148_v58, %v2424_v20  ;;  %v1199_v12 = vsub.f32 %v2182_v21, %v2424_v20  ;;  %v1200_v50 = vsub.f32 %v2233_v15, %v2424_v20  ;;  %v1201_v62 = vsub.f32 %v2263_v63, %v2424_v20 }
 0x203   : > { %v1202_v49 = vsub.f32 %v2216_v60, %v2424_v20  ;;  %v1203_v8 = vsub.f32 %v2250_v35, %v2424_v20  ;;  %v1204_v36 = vsub.f32 %v2301_v10, %v2424_v20  ;;  %v1205_v58 = vsub.f32 %v2331_v57, %v2424_v20 }
 0x204   : > { %v1206_v7 = vsub.f32 %v2284_v29, %v2424_v20  ;;  %v1207_v21 = vsub.f32 %v2318_v2, %v2424_v20  ;;  %v1208_v34 = vsub.f32 %v2370_v26, %v2424_v20  ;;  %v1209_v60 = vsub.f32 %v832_v33, %v2424_v20 }
 0x205   : > { %v2460_v15 = vsel %vm1056_vm15, %v1193_v30, 0.0  ;;  %v1181_v35 = vsub.f32 %v1923_v59, %v2424_v20  ;;  %v1182_v57 = vsub.f32 %v1874_v43, %v2424_v20  ;;  %v2469_v63 = vsel %vm1059_vm1, %v1196_v31, 0.0 }
 0x206   : > { %v2474_v26 = vsel %vm1060_vm0, %v1197_v40, 0.0  ;;  %v2479_v13 = vsel %vm1061_vm13, %v1198_v61, 0.0  ;;  %v2484_v59 = vsel %vm1062_vm14, %v1199_v12, 0.0  ;;  %v2489_v43 = vsel %vm1063_vm12, %v1200_v50, 0.0  ;;  %v2775_v50 = vld [vmem:[#allocation6_spill] sm:$0xff] }
 0x207   : > { %v2494_v32 = vsel %vm1064_vm9, %v1201_v62, 0.0  ;;  %v2499_v45 = vsel %vm1065_vm11, %v1202_v49, 0.0  ;;  %v2504_v0 = vsel %vm1066_vm10, %v1203_v8, 0.0  ;;  %v2509_v14 = vsel %vm1067_vm8, %v1204_v36, 0.0  ;;  %v2776_v49 = vld [vmem:[#allocation4_spill] sm:$0xff] }
 0x208   : > { %v2514_v27 = vsel %vm1068_vm4, %v1205_v58, 0.0  ;;  %v2519_v56 = vsel %vm2760_vm2, %v1206_v7, 0.0  ;;  %vm2761_vm9 = vcmp.lt.s32.totalorder %v2307_v3, %v1890_v48  ;;  %vm2762_vm10 = vcmp.lt.s32.totalorder %v2324_v54, %v1890_v48  ;;  %v2778_v58 = vld [vmem:[#allocation10_spill] sm:$0xff] }
 0x209   : > { %v2524_v4 = vsel %vm2761_vm9, %v1207_v21, 0.0  ;;  %v2529_v24 = vsel %vm2762_vm10, %v1208_v34, 0.0  ;;  %v2534_v47 = vsel %vm1072_vm7, %v1209_v60, 0.0  ;;  %v1183_v11 = vsub.f32 %v1905_v53, %v2424_v20  ;;  %v2779_v60 = vld [vmem:[#allocation7_spill] sm:$0xff] }
 0x20a   : > { %vm2763_vm4 = vcmp.lt.s32.totalorder %v1868_v42, %v1890_v48  ;;  %vm2764_vm8 = vcmp.lt.s32.totalorder %v1885_v46, %v1890_v48  ;;  %v1184_v39 = vsub.f32 %v1961_v9, %v2424_v20  ;;  %vm2765_vm11 = vcmp.lt.s32.totalorder %v1882_v44, %v1890_v48 }
 0x20b   : > { %v1212_v29 = vsel %vm2763_vm4, %v1180_v38, 0.0  ;;  %v1213_v3 = vsel %vm2764_vm8, %v1181_v35, 0.0  ;;  %v1214_v10 = vsel %vm2765_vm11, %v1182_v57, 0.0  ;;  %v1185_v53 = vsub.f32 %v1991_v22, %v2424_v20 }
 0x20c   : > { %v1244_v2 = vmul.f32 %v1212_v29, %v1212_v29  ;;  %v1245_v54 = vmul.f32 %v1213_v3, %v1213_v3  ;;  %vm2766_vm7 = vcmp.lt.s32.totalorder %v1898_v51, %v1890_v48  ;;  %v1246_v25 = vmul.f32 %v1214_v10, %v1214_v10  ;;  %v2782_v3 = vld [vmem:[#allocation21_spill] sm:$0xff]  ;;  %v2783_v10 = vld [vmem:[#allocation15_spill] sm:$0xff] }
 0x20d   : > { %v1215_v42 = vsel %vm2766_vm7, %v1183_v11, 0.0  ;;  %v1186_v46 = vsub.f32 %v1943_v1, %v2424_v20  ;;  %vm2767_vm12 = vcmp.lt.s32.totalorder %v1912_v55, %v1890_v48  ;;  %v1187_v22 = vsub.f32 %v1978_v16, %v2424_v20  ;;  %v2772_v16 = vld [vmem:[#allocation12_spill] sm:$0xff]  ;;  %v2781_v11 = vld [vmem:[#allocation18_spill] sm:$0xff] }
 0x20e   : > { %v1216_v9 = vsel %vm2767_vm12, %v1184_v39, 0.0  ;;  %v1247_v33 = vmul.f32 %v1215_v42, %v1215_v42  ;;  %v1276_v44 = vsel %vm1107_vm6, %v1244_v2, 0.0  ;;  %v1277_v41 = vsel %vm1107_vm6, %v1245_v54, 0.0  ;;  %v2784_v42 = vld [vmem:[#allocation5_spill] sm:$0xff] }
 0x20f   : > { %vm2768_vm13 = vcmp.lt.s32.totalorder %v1950_v5, %v1890_v48  ;;  %v1278_v28 = vadd.f32 %v1277_v41, %v1276_v44  ;;  %v1248_v23 = vmul.f32 %v1216_v9, %v1216_v9  ;;  %v1279_v1 = vsel %vm1107_vm6, %v1246_v25, 0.0  ;;  %v2773_v5 = vld [vmem:[#allocation3_spill] sm:$0xff] }
 0x210   : > { %v1217_v51 = vsel %vm2768_vm13, %v1185_v53, 0.0  ;;  %v1188_v55 = vsub.f32 %v2769_v18, %v2424_v20  ;;  %vm2771_vm14 = vcmp.lt.s32.totalorder %v2770_v6, %v1890_v48  ;;  %v1281_v30 = vsel %vm1107_vm6, %v1247_v33, 0.0  ;;  %v2790_v6 = vld [vmem:[#allocation14_spill] sm:$0xff] }
 0x211   : > { %v1218_v17 = vsel %vm2771_vm14, %v1186_v46, 0.0  ;;  %v1280_v52 = vadd.f32 %v1279_v1, %v1278_v28  ;;  %v1249_v19 = vmul.f32 %v1217_v51, %v1217_v51  ;;  %v1189_v38 = vsub.f32 %v2772_v16, %v2424_v20  ;;  %v2788_v28 = vld [vmem:[#allocation9_spill] sm:$0xff] }
 0x212   : > { %vm2774_vm15 = vcmp.lt.s32.totalorder %v2773_v5, %v1890_v48  ;;  %v1250_v61 = vmul.f32 %v1218_v17, %v1218_v17  ;;  %v1283_v12 = vsel %vm1107_vm6, %v1248_v23, 0.0  ;;  %v1190_v62 = vsub.f32 %v2775_v50, %v2424_v20  ;;  %v2793_v5 = vld [vmem:[#allocation17_spill] sm:$0xff] }
 0x213   : > { %v1219_v31 = vsel %vm2774_vm15, %v1187_v22, 0.0  ;;  %v1282_v40 = vadd.f32 %v1281_v30, %v1280_v52  ;;  %vm2777_vm0 = vcmp.lt.s32.totalorder %v2776_v49, %v1890_v48  ;;  %v1191_v7 = vsub.f32 %v2778_v58, %v2424_v20  ;;  %v2791_v52 = vld [vmem:[#allocation11_spill] sm:$0xff]  ;;  %v2794_v50 = vld [vmem:[#allocation13_spill] sm:$0xff]  ;;  %v2796_v58 = vld [vmem:[#allocation16_spill] sm:$0xff] }
 0x214   : > { %v1220_v8 = vsel %vm2777_vm0, %v1188_v55, 0.0  ;;  %v1251_v21 = vmul.f32 %v1219_v31, %v1219_v31  ;;  %v1285_v34 = vsel %vm1107_vm6, %v1249_v19, 0.0  ;;  %vm2780_vm1 = vcmp.lt.s32.totalorder %v2779_v60, %v1890_v48 }
 0x215   : > { %v1284_v36 = vadd.f32 %v1283_v12, %v1282_v40  ;;  %v1221_v35 = vsel %vm2780_vm1, %v1189_v38, 0.0  ;;  %v1210_v29 = vsub.f32 %v2781_v11, %v2424_v20  ;;  %v1211_v39 = vsub.f32 %v2782_v3, %v2424_v20 }
 0x216   : > { %v1192_v2 = vsub.f32 %v2783_v10, %v2424_v20  ;;  %v1252_v54 = vmul.f32 %v1220_v8, %v1220_v8  ;;  %v1287_v53 = vsel %vm1107_vm6, %v1250_v61, 0.0  ;;  %vm2785_vm2 = vcmp.lt.s32.totalorder %v2784_v42, %v1890_v48 }
 0x217   : > { %v1286_v57 = vadd.f32 %v1285_v34, %v1284_v36  ;;  %v1222_v25 = vsel %vm2785_vm2, %v1190_v62, 0.0  ;;  %v2603_v33 = vsel %vm1073_vm5, %v1210_v29, 0.0  ;;  %v2608_v41 = vsel %vm1074_vm3, %v1211_v39, 0.0 }
 0x218   : > { %v1253_v22 = vmul.f32 %v1221_v35, %v1221_v35  ;;  %v1289_v51 = vsel %vm1107_vm6, %v1251_v21, 0.0  ;;  %vm2789_vm9 = vcmp.lt.s32.totalorder %v2788_v28, %v1890_v48  ;;  %v1254_v18 = vmul.f32 %v1222_v25, %v1222_v25 }
 0x219   : > { %v1288_v46 = vadd.f32 %v1287_v53, %v1286_v57  ;;  %v1223_v23 = vsel %vm2789_vm9, %v1191_v7, 0.0  ;;  %v1291_v55 = vsel %vm1107_vm6, %v1252_v54, 0.0  ;;  %v1194_v17 = vsub.f32 %v2790_v6, %v2424_v20 }
 0x21a   : > { %vm2792_vm5 = vcmp.lt.s32.totalorder %v2791_v52, %v1890_v48  ;;  %v1255_v16 = vmul.f32 %v1223_v23, %v1223_v23  ;;  %v1293_v38 = vsel %vm1107_vm6, %v1253_v22, 0.0  ;;  %v1195_v31 = vsub.f32 %v2793_v5, %v2424_v20 }
 0x21b   : > { %v1290_v1 = vadd.f32 %v1289_v51, %v1288_v46  ;;  %v1224_v19 = vsel %vm2792_vm5, %v1192_v2, 0.0  ;;  %v1295_v12 = vsel %vm1107_vm6, %v1254_v18, 0.0  ;;  %vm2795_vm3 = vcmp.lt.s32.totalorder %v2794_v50, %v1890_v48 }
 0x21c   : > { %v1256_v61 = vmul.f32 %v1224_v19, %v1224_v19  ;;  %v1226_v62 = vsel %vm2795_vm3, %v1194_v17, 0.0  ;;  %v1257_v8 = vmul.f32 %v2460_v15, %v2460_v15  ;;  %v1297_v36 = vsel %vm1107_vm6, %v1255_v16, 0.0 }
 0x21d   : > { %v1292_v30 = vadd.f32 %v1291_v55, %v1290_v1  ;;  %vm2797_vm10 = vcmp.lt.s32.totalorder %v2796_v58, %v1890_v48  ;;  %v1258_v20 = vmul.f32 %v1226_v62, %v1226_v62  ;;  %v1260_v29 = vmul.f32 %v2469_v63, %v2469_v63 }
 0x21e   : > { %v1227_v7 = vsel %vm2797_vm10, %v1195_v31, 0.0  ;;  %v1299_v34 = vsel %vm1107_vm6, %v1256_v61, 0.0  ;;  %v1301_v57 = vsel %vm1107_vm6, %v1257_v8, 0.0  ;;  %v1261_v39 = vmul.f32 %v2474_v26, %v2474_v26 }
 0x21f   : > { %v1294_v40 = vadd.f32 %v1293_v38, %v1292_v30  ;;  %v1259_v35 = vmul.f32 %v1227_v7, %v1227_v7  ;;  %v1303_v15 = vsel %vm1107_vm6, %v1258_v20, 0.0  ;;  %v1262_v2 = vmul.f32 %v2479_v13, %v2479_v13 }
 0x220   : > { %v1307_v54 = vsel %vm1107_vm6, %v1260_v29, 0.0  ;;  %v1263_v42 = vmul.f32 %v2484_v59, %v2484_v59  ;;  %v1309_v63 = vsel %vm1107_vm6, %v1261_v39, 0.0  ;;  %v1264_v46 = vmul.f32 %v2489_v43, %v2489_v43 }
 0x221   : > { %v1296_v49 = vadd.f32 %v1295_v12, %v1294_v40  ;;  %v1305_v48 = vsel %vm1107_vm6, %v1259_v35, 0.0  ;;  %v1311_v26 = vsel %vm1107_vm6, %v1262_v2, 0.0  ;;  %v1265_v44 = vmul.f32 %v2494_v32, %v2494_v32 }
 0x222   : > { %v1313_v13 = vsel %vm1107_vm6, %v1263_v42, 0.0  ;;  %v1266_v51 = vmul.f32 %v2499_v45, %v2499_v45  ;;  %v1315_v59 = vsel %vm1107_vm6, %v1264_v46, 0.0  ;;  %v1267_v23 = vmul.f32 %v2504_v0, %v2504_v0 }
 0x223   : > { %v1298_v21 = vadd.f32 %v1297_v36, %v1296_v49  ;;  %v1317_v43 = vsel %vm1107_vm6, %v1265_v44, 0.0  ;;  %v1268_v18 = vmul.f32 %v2509_v14, %v2509_v14  ;;  %v1269_v6 = vmul.f32 %v2514_v27, %v2514_v27 }
 0x224   : > { %v1319_v32 = vsel %vm1107_vm6, %v1266_v51, 0.0  ;;  %v1321_v45 = vsel %vm1107_vm6, %v1267_v23, 0.0  ;;  %v1270_v52 = vmul.f32 %v2519_v56, %v2519_v56  ;;  %v1271_v30 = vmul.f32 %v2524_v4, %v2524_v4 }
 0x225   : > { %v1300_v60 = vadd.f32 %v1299_v34, %v1298_v21  ;;  %v1323_v0 = vsel %vm1107_vm6, %v1268_v18, 0.0  ;;  %v1325_v14 = vsel %vm1107_vm6, %v1269_v6, 0.0  ;;  %v1272_v38 = vmul.f32 %v2529_v24, %v2529_v24 }
 0x226   : > { %v1327_v27 = vsel %vm1107_vm6, %v1270_v52, 0.0  ;;  %v1273_v31 = vmul.f32 %v2534_v47, %v2534_v47  ;;  %v1329_v56 = vsel %vm1107_vm6, %v1271_v30, 0.0  ;;  %v1274_v4 = vmul.f32 %v2603_v33, %v2603_v33 }
 0x227   : > { %v1302_v11 = vadd.f32 %v1301_v57, %v1300_v60  ;;  %v1331_v61 = vsel %vm1107_vm6, %v1272_v38, 0.0  ;;  %v1275_v24 = vmul.f32 %v2608_v41, %v2608_v41  ;;  %vm1350_vm4 = vcmask 122880  }
 0x228   : > { %v1333_v50 = vsel %vm1107_vm6, %v1273_v31, 0.0  ;;  %v1335_v49 = vsel %vm1107_vm6, %v1274_v4, 0.0 }
 0x229   : > { %v1304_v3 = vadd.f32 %v1303_v15, %v1302_v11  ;;  %v1337_v8 = vsel %vm1107_vm6, %v1275_v24, 0.0 }
 0x22b   : > { %v1306_v10 = vadd.f32 %v1305_v48, %v1304_v3 }
 0x22d   : > { %v1308_v53 = vadd.f32 %v1307_v54, %v1306_v10 }
 0x22f   : > { %v1310_v25 = vadd.f32 %v1309_v63, %v1308_v53 }
 0x231   : > { %v1312_v9 = vadd.f32 %v1311_v26, %v1310_v25 }
 0x233   : > { %v1314_v22 = vadd.f32 %v1313_v13, %v1312_v9 }
 0x235   : > { %v1316_v28 = vadd.f32 %v1315_v59, %v1314_v22 }
 0x237   : > { %v1318_v1 = vadd.f32 %v1317_v43, %v1316_v28 }
 0x239   : > { %v1320_v55 = vadd.f32 %v1319_v32, %v1318_v1 }
 0x23b   : > { %v1322_v17 = vadd.f32 %v1321_v45, %v1320_v55 }
 0x23d   : > { %v1324_v19 = vadd.f32 %v1323_v0, %v1322_v17 }
 0x23f   : > { %v1326_v16 = vadd.f32 %v1325_v14, %v1324_v19 }
 0x241   : > { %v1328_v5 = vadd.f32 %v1327_v27, %v1326_v16 }
 0x243   : > { %v1330_v40 = vadd.f32 %v1329_v56, %v1328_v5 }
 0x245   : > { %v1332_v12 = vadd.f32 %v1331_v61, %v1330_v40 }
 0x247   : > { %v1334_v62 = vadd.f32 %v1333_v50, %v1332_v12 }
 0x249   : > { %v1336_v47 = vadd.f32 %v1335_v49, %v1334_v62 }
 0x24b   : > { %v1338_v36 = vadd.f32 %v1337_v8, %v1336_v47 }
 0x24d   : > { %v1339_v58 = vrot.slane %v1338_v36, 4 }
 0x24f   : > { %v1340_v7 = vadd.f32 %v1339_v58, %v1338_v36 }
 0x251   : > { %v1341_v21 = vrot.slane %v1340_v7, 2 }
 0x253   : > { %v1342_v20 = vadd.f32 %v1341_v21, %v1340_v7 }
 0x255   : > { %v1343_v33 = vrot.slane %v1342_v20, 1 }
 0x257   : > { %v1344_v34 = vadd.f32 %v1343_v33, %v1342_v20 }
 0x259   : > { %1346 = vrot.lane.b32.xlu0 %v1344_v34, %s1688_s29 }
 0x2cb   : > { %v1347_v41 = vpop.permute.xlu0 %1346 }
 0x2cc   : > { %v1349_v60 = vsel %vm1107_vm6, %v2421_v37, %v1347_v41 }
 0x2cd   : > { %1351 = vst.msk [vmem:[%s263_s8] sm:$0x1] %vm1350_vm4, %v1349_v60 }
 0x2ce PF: > { %s17_s21 = sadd.s32 1, %s1686_s21  }
 0x2cf   : > { %p14_p6 = scmp.ge.s32.totalorder %s17_s21, 4  }
 0x2d1   :  { %16 = sbr.rel (!%p14_p6) target bundleno = 1 (0x1), region = 82 }

</bundles_post_ra>
